<compile_context>
chip_gen: v7x
topology: tpu7x:2x2x1
jax: 0.10.0
libtpu: 0.0.40
codegen_flags: <defaults>
</compile_context>

<pallas_src>
from math import exp

import numpy as np
import jax
import jax.numpy as jnp
from jax.experimental import pallas as pl
from jax.experimental.pallas import tpu as pltpu

WINDOW_SIZE = 11
SIGMA = 1.5
C1 = 0.01 ** 2
C2 = 0.03 ** 2


def _gaussian_1d(window_size, sigma):
    g = [exp(-(x - window_size // 2) ** 2 / float(2 * sigma ** 2))
         for x in range(window_size)]
    s = sum(g)
    return [v / s for v in g]


def _band_h(kern, n):
    """(n, n) matrix M such that (x @ M) == 1-D cross-correlation of each row
    of x with `kern`, zero padding = len(kern)//2 (truncation == zero pad)."""
    k = len(kern)
    pad = k // 2
    m = np.zeros((n, n), np.float32)
    for c_out in range(n):
        for t in range(k):
            c_in = c_out + t - pad
            if 0 <= c_in < n:
                m[c_in, c_out] = kern[t]
    return jnp.asarray(m)


def _band_v(kern, n):
    """(n, n) matrix N such that (N @ x) == 1-D cross-correlation of each
    column of x with `kern`, zero padding = len(kern)//2."""
    k = len(kern)
    pad = k // 2
    m = np.zeros((n, n), np.float32)
    for r_out in range(n):
        for t in range(k):
            r_in = r_out + t - pad
            if 0 <= r_in < n:
                m[r_out, r_in] = kern[t]
    return jnp.asarray(m)


def _scoped_vmem_limit():
    # Generation-gated scoped-VMEM: ~96 MiB on 128-MiB parts (v5e/v6e),
    # ~48 MiB on v7x's 64-MiB parts.
    try:
        cap = pltpu.get_tpu_info().vmem_capacity_bytes
    except Exception:
        cap = 64 * 1024 * 1024
    return int(min(96 * 1024 * 1024, (cap * 3) // 4))


def _l_ssim_kernel(a_ref, b_ref, f_ref,
                   gh_ref, gv_ref, sxh_ref, sxv_ref, syh_ref, syv_ref,
                   out_ref):
    """One grid step = one batch element.

    a_ref, b_ref, f_ref : (H, W) VMEM blocks (unpadded images)
    gh/gv               : (W, W) / (H, H) Gaussian band matrices
    sxh/sxv, syh/syv    : Sobel-x / Sobel-y separable band matrices
    out_ref             : (1, 128) lane-dense per-image partials:
                          [mean|grad A|, mean|grad B|, ssim(A,F), ssim(B,F), 0...]
    """
    a = a_ref[...]
    b = b_ref[...]
    f = f_ref[...]

    gh = gh_ref[...]
    gv = gv_ref[...]

    def blur(x):
        # Separable 11x11 Gaussian (zero pad 5) as two MXU band matmuls.
        h = jnp.dot(x, gh, preferred_element_type=jnp.float32)
        return jnp.dot(gv, h, preferred_element_type=jnp.float32)

    def sobel_mean(x):
        # |dx| + |dy| mean; each Sobel kernel is separable -> 2 band matmuls.
        sx = jnp.dot(sxv_ref[...],
                     jnp.dot(x, sxh_ref[...], preferred_element_type=jnp.float32),
                     preferred_element_type=jnp.float32)
        sy = jnp.dot(syv_ref[...],
                     jnp.dot(x, syh_ref[...], preferred_element_type=jnp.float32),
                     preferred_element_type=jnp.float32)
        return jnp.mean(jnp.abs(sx) + jnp.abs(sy))

    def ssim_mean(mu1, mu2, e11, e22, e12):
        mu1_sq = mu1 * mu1
        mu2_sq = mu2 * mu2
        mu12 = mu1 * mu2
        sig1 = e11 - mu1_sq
        sig2 = e22 - mu2_sq
        sig12 = e12 - mu12
        num = (2.0 * mu12 + C1) * (2.0 * sig12 + C2)
        den = (mu1_sq + mu2_sq + C1) * (sig1 + sig2 + C2)
        # Exact reciprocal on the (otherwise idle) EUP slot instead of a divide.
        return jnp.mean(num * pl.reciprocal(den, approx=False))

    grad_a = sobel_mean(a)
    grad_b = sobel_mean(b)

    # Fused-image moments are shared between ssim(A,F) and ssim(B,F).
    mu_f = blur(f)
    s_ff = blur(f * f)

    mu_a = blur(a)
    s_aa = blur(a * a)
    s_af = blur(a * f)
    ssim_af = ssim_mean(mu_a, mu_f, s_aa, s_ff, s_af)

    mu_b = blur(b)
    s_bb = blur(b * b)
    s_bf = blur(b * f)
    ssim_bf = ssim_mean(mu_b, mu_f, s_bb, s_ff, s_bf)

    lane = jax.lax.broadcasted_iota(jnp.int32, (1, 128), 1)
    row = jnp.where(lane == 0, grad_a, 0.0)
    row = row + jnp.where(lane == 1, grad_b, 0.0)
    row = row + jnp.where(lane == 2, ssim_af, 0.0)
    row = row + jnp.where(lane == 3, ssim_bf, 0.0)
    out_ref[...] = row.astype(jnp.float32)


def l_ssim_loss(image_A, image_B, image_fused):
    """Equivalent of L_SSIM().forward(image_A, image_B, image_fused)."""
    B, C, H, W = image_A.shape
    assert C == 1, "Sobelxy (1-in-channel 3x3 conv) requires single-channel images"

    a = image_A[:, 0].astype(jnp.float32)
    b = image_B[:, 0].astype(jnp.float32)
    f = image_fused[:, 0].astype(jnp.float32)

    g = _gaussian_1d(WINDOW_SIZE, SIGMA)
    gh = _band_h(g, W)                        # Gaussian, horizontal pass
    gv = _band_v(g, H)                        # Gaussian, vertical pass
    sxh = _band_h([-1.0, 0.0, 1.0], W)        # Sobel-x horizontal taps
    sxv = _band_v([1.0, 2.0, 1.0], H)         # Sobel-x vertical taps
    syh = _band_h([1.0, 2.0, 1.0], W)         # Sobel-y horizontal taps
    syv = _band_v([1.0, 0.0, -1.0], H)        # Sobel-y vertical taps

    img_spec = pl.BlockSpec((None, H, W), lambda i: (i, 0, 0))
    wband_spec = pl.BlockSpec((W, W), lambda i: (0, 0))   # VMEM-resident, not re-fetched
    hband_spec = pl.BlockSpec((H, H), lambda i: (0, 0))

    parts = pl.pallas_call(
        _l_ssim_kernel,
        out_shape=jax.ShapeDtypeStruct((B, 1, 128), jnp.float32),
        grid=(B,),
        in_specs=[img_spec, img_spec, img_spec,
                  wband_spec, hband_spec,
                  wband_spec, hband_spec,
                  wband_spec, hband_spec],
        out_specs=pl.BlockSpec((None, 1, 128), lambda i: (i, 0, 0)),
        compiler_params=pltpu.CompilerParams(
            # No cross-step state -> batch axis can shard across TensorCores.
            dimension_semantics=("parallel",),
            vmem_limit_bytes=_scoped_vmem_limit(),
        ),
    )(a, b, f, gh, gv, sxh, sxv, syh, syv)

    parts = parts[:, 0, :]                    # (B, 128)
    mean_grad_a = jnp.mean(parts[:, 0])
    mean_grad_b = jnp.mean(parts[:, 1])
    ssim_af = jnp.mean(parts[:, 2])
    ssim_bf = jnp.mean(parts[:, 3])

    denom = mean_grad_a + mean_grad_b         # NaN for constant images, same as reference
    weight_a = mean_grad_a / denom
    weight_b = mean_grad_b / denom
    return weight_a * ssim_af + weight_b * ssim_bf


if __name__ == "__main__":
    key = jax.random.PRNGKey(0)
    kA, kB, kF = jax.random.split(key, 3)
    shape = (2, 1, 16, 16)  # NCHW, C must be 1 (Sobelxy is a 1-in-channel conv)
    image_A = jax.random.uniform(kA, shape, dtype=jnp.float32)
    image_B = jax.random.uniform(kB, shape, dtype=jnp.float32)
    image_fused = jax.random.uniform(kF, shape, dtype=jnp.float32)

    loss = jax.block_until_ready(l_ssim_loss(image_A, image_B, image_fused))
    assert loss.shape == () and bool(jnp.isfinite(loss))
    print("KERNEL_OK")
</pallas_src>

<mosaic_0001>
module attributes {stable_mosaic.version = 11 : i64} {
  func.func @_l_ssim_kernel(%arg0: i32, %arg1: memref<1x16x16xf32, #tpu.memory_space<vmem>>, %arg2: memref<1x16x16xf32, #tpu.memory_space<vmem>>, %arg3: memref<1x16x16xf32, #tpu.memory_space<vmem>>, %arg4: memref<16x16xf32, #tpu.memory_space<vmem>>, %arg5: memref<16x16xf32, #tpu.memory_space<vmem>>, %arg6: memref<16x16xf32, #tpu.memory_space<vmem>>, %arg7: memref<16x16xf32, #tpu.memory_space<vmem>>, %arg8: memref<16x16xf32, #tpu.memory_space<vmem>>, %arg9: memref<16x16xf32, #tpu.memory_space<vmem>>, %arg10: memref<1x1x128xf32, #tpu.memory_space<vmem>>) attributes {dimension_semantics = [#tpu.dimension_semantics<parallel>], iteration_bounds = array<i64: 2>, scalar_prefetch = 0 : i64, scratch_operands = 0 : i64, tpu.core_type = #tpu.core_type<tc>, window_params = [{transform_indices = @transform_0, window_bounds = array<i64: 1, 16, 16>}, {transform_indices = @transform_1, window_bounds = array<i64: 1, 16, 16>}, {transform_indices = @transform_2, window_bounds = array<i64: 1, 16, 16>}, {pipeline_mode = #tpu.pipeline_mode<synchronous>, transform_indices = @transform_3, window_bounds = array<i64: 16, 16>}, {pipeline_mode = #tpu.pipeline_mode<synchronous>, transform_indices = @transform_4, window_bounds = array<i64: 16, 16>}, {pipeline_mode = #tpu.pipeline_mode<synchronous>, transform_indices = @transform_5, window_bounds = array<i64: 16, 16>}, {pipeline_mode = #tpu.pipeline_mode<synchronous>, transform_indices = @transform_6, window_bounds = array<i64: 16, 16>}, {pipeline_mode = #tpu.pipeline_mode<synchronous>, transform_indices = @transform_7, window_bounds = array<i64: 16, 16>}, {pipeline_mode = #tpu.pipeline_mode<synchronous>, transform_indices = @transform_8, window_bounds = array<i64: 16, 16>}, {transform_indices = @transform_9, window_bounds = array<i64: 1, 1, 128>}]} {
    %c0 = arith.constant 0 : index
    %c0_0 = arith.constant 0 : index
    %c0_1 = arith.constant 0 : index
    %0 = vector.load %arg1[%c0, %c0_0, %c0_1] : memref<1x16x16xf32, #tpu.memory_space<vmem>>, vector<1x16x16xf32>
    %1 = vector.shape_cast %0 : vector<1x16x16xf32> to vector<16x16xf32>
    %c0_2 = arith.constant 0 : index
    %c0_3 = arith.constant 0 : index
    %c0_4 = arith.constant 0 : index
    %2 = vector.load %arg2[%c0_2, %c0_3, %c0_4] : memref<1x16x16xf32, #tpu.memory_space<vmem>>, vector<1x16x16xf32>
    %3 = vector.shape_cast %2 : vector<1x16x16xf32> to vector<16x16xf32>
    %c0_5 = arith.constant 0 : index
    %c0_6 = arith.constant 0 : index
    %c0_7 = arith.constant 0 : index
    %4 = vector.load %arg3[%c0_5, %c0_6, %c0_7] : memref<1x16x16xf32, #tpu.memory_space<vmem>>, vector<1x16x16xf32>
    %5 = vector.shape_cast %4 : vector<1x16x16xf32> to vector<16x16xf32>
    %c0_8 = arith.constant 0 : index
    %c0_9 = arith.constant 0 : index
    %6 = vector.load %arg4[%c0_8, %c0_9] : memref<16x16xf32, #tpu.memory_space<vmem>>, vector<16x16xf32>
    %c0_10 = arith.constant 0 : index
    %c0_11 = arith.constant 0 : index
    %7 = vector.load %arg5[%c0_10, %c0_11] : memref<16x16xf32, #tpu.memory_space<vmem>>, vector<16x16xf32>
    %c0_12 = arith.constant 0 : index
    %c0_13 = arith.constant 0 : index
    %8 = vector.load %arg7[%c0_12, %c0_13] : memref<16x16xf32, #tpu.memory_space<vmem>>, vector<16x16xf32>
    %c0_14 = arith.constant 0 : index
    %c0_15 = arith.constant 0 : index
    %9 = vector.load %arg6[%c0_14, %c0_15] : memref<16x16xf32, #tpu.memory_space<vmem>>, vector<16x16xf32>
    %cst = arith.constant dense<0.000000e+00> : vector<16x16xf32>
    %10 = tpu.matmul %1, %9, %cst {dimension_numbers = #tpu.dot_dimension_numbers<[1], [0], [0], [1], [0, 0, 1, 1], [], []>} : vector<16x16xf32>, vector<16x16xf32>, vector<16x16xf32> -> vector<16x16xf32>
    %cst_16 = arith.constant dense<0.000000e+00> : vector<16x16xf32>
    %11 = tpu.matmul %8, %10, %cst_16 {dimension_numbers = #tpu.dot_dimension_numbers<[1], [0], [0], [1], [0, 0, 1, 1], [], []>} : vector<16x16xf32>, vector<16x16xf32>, vector<16x16xf32> -> vector<16x16xf32>
    %c0_17 = arith.constant 0 : index
    %c0_18 = arith.constant 0 : index
    %12 = vector.load %arg9[%c0_17, %c0_18] : memref<16x16xf32, #tpu.memory_space<vmem>>, vector<16x16xf32>
    %c0_19 = arith.constant 0 : index
    %c0_20 = arith.constant 0 : index
    %13 = vector.load %arg8[%c0_19, %c0_20] : memref<16x16xf32, #tpu.memory_space<vmem>>, vector<16x16xf32>
    %cst_21 = arith.constant dense<0.000000e+00> : vector<16x16xf32>
    %14 = tpu.matmul %1, %13, %cst_21 {dimension_numbers = #tpu.dot_dimension_numbers<[1], [0], [0], [1], [0, 0, 1, 1], [], []>} : vector<16x16xf32>, vector<16x16xf32>, vector<16x16xf32> -> vector<16x16xf32>
    %cst_22 = arith.constant dense<0.000000e+00> : vector<16x16xf32>
    %15 = tpu.matmul %12, %14, %cst_22 {dimension_numbers = #tpu.dot_dimension_numbers<[1], [0], [0], [1], [0, 0, 1, 1], [], []>} : vector<16x16xf32>, vector<16x16xf32>, vector<16x16xf32> -> vector<16x16xf32>
    %16 = math.absf %11 : vector<16x16xf32>
    %17 = math.absf %15 : vector<16x16xf32>
    %18 = arith.addf %16, %17 : vector<16x16xf32>
    %19 = vector.shape_cast %18 : vector<16x16xf32> to vector<1x16x16xf32>
    %cst_23 = arith.constant dense<0.000000e+00> : vector<1xf32>
    %20 = vector.multi_reduction <add>, %19, %cst_23 [1, 2] : vector<1x16x16xf32> to vector<1xf32>
    %21 = vector.shape_cast %20 : vector<1xf32> to vector<1x1x1xf32>
    %22 = vector.extract %21[0, 0, 0] : f32 from vector<1x1x1xf32>
    %cst_24 = arith.constant 2.560000e+02 : f32
    %23 = arith.divf %22, %cst_24 : f32
    %c0_25 = arith.constant 0 : index
    %c0_26 = arith.constant 0 : index
    %24 = vector.load %arg7[%c0_25, %c0_26] : memref<16x16xf32, #tpu.memory_space<vmem>>, vector<16x16xf32>
    %c0_27 = arith.constant 0 : index
    %c0_28 = arith.constant 0 : index
    %25 = vector.load %arg6[%c0_27, %c0_28] : memref<16x16xf32, #tpu.memory_space<vmem>>, vector<16x16xf32>
    %cst_29 = arith.constant dense<0.000000e+00> : vector<16x16xf32>
    %26 = tpu.matmul %3, %25, %cst_29 {dimension_numbers = #tpu.dot_dimension_numbers<[1], [0], [0], [1], [0, 0, 1, 1], [], []>} : vector<16x16xf32>, vector<16x16xf32>, vector<16x16xf32> -> vector<16x16xf32>
    %cst_30 = arith.constant dense<0.000000e+00> : vector<16x16xf32>
    %27 = tpu.matmul %24, %26, %cst_30 {dimension_numbers = #tpu.dot_dimension_numbers<[1], [0], [0], [1], [0, 0, 1, 1], [], []>} : vector<16x16xf32>, vector<16x16xf32>, vector<16x16xf32> -> vector<16x16xf32>
    %c0_31 = arith.constant 0 : index
    %c0_32 = arith.constant 0 : index
    %28 = vector.load %arg9[%c0_31, %c0_32] : memref<16x16xf32, #tpu.memory_space<vmem>>, vector<16x16xf32>
    %c0_33 = arith.constant 0 : index
    %c0_34 = arith.constant 0 : index
    %29 = vector.load %arg8[%c0_33, %c0_34] : memref<16x16xf32, #tpu.memory_space<vmem>>, vector<16x16xf32>
    %cst_35 = arith.constant dense<0.000000e+00> : vector<16x16xf32>
    %30 = tpu.matmul %3, %29, %cst_35 {dimension_numbers = #tpu.dot_dimension_numbers<[1], [0], [0], [1], [0, 0, 1, 1], [], []>} : vector<16x16xf32>, vector<16x16xf32>, vector<16x16xf32> -> vector<16x16xf32>
    %cst_36 = arith.constant dense<0.000000e+00> : vector<16x16xf32>
    %31 = tpu.matmul %28, %30, %cst_36 {dimension_numbers = #tpu.dot_dimension_numbers<[1], [0], [0], [1], [0, 0, 1, 1], [], []>} : vector<16x16xf32>, vector<16x16xf32>, vector<16x16xf32> -> vector<16x16xf32>
    %32 = math.absf %27 : vector<16x16xf32>
    %33 = math.absf %31 : vector<16x16xf32>
    %34 = arith.addf %32, %33 : vector<16x16xf32>
    %35 = vector.shape_cast %34 : vector<16x16xf32> to vector<1x16x16xf32>
    %cst_37 = arith.constant dense<0.000000e+00> : vector<1xf32>
    %36 = vector.multi_reduction <add>, %35, %cst_37 [1, 2] : vector<1x16x16xf32> to vector<1xf32>
    %37 = vector.shape_cast %36 : vector<1xf32> to vector<1x1x1xf32>
    %38 = vector.extract %37[0, 0, 0] : f32 from vector<1x1x1xf32>
    %cst_38 = arith.constant 2.560000e+02 : f32
    %39 = arith.divf %38, %cst_38 : f32
    %cst_39 = arith.constant dense<0.000000e+00> : vector<16x16xf32>
    %40 = tpu.matmul %5, %6, %cst_39 {dimension_numbers = #tpu.dot_dimension_numbers<[1], [0], [0], [1], [0, 0, 1, 1], [], []>} : vector<16x16xf32>, vector<16x16xf32>, vector<16x16xf32> -> vector<16x16xf32>
    %cst_40 = arith.constant dense<0.000000e+00> : vector<16x16xf32>
    %41 = tpu.matmul %7, %40, %cst_40 {dimension_numbers = #tpu.dot_dimension_numbers<[1], [0], [0], [1], [0, 0, 1, 1], [], []>} : vector<16x16xf32>, vector<16x16xf32>, vector<16x16xf32> -> vector<16x16xf32>
    %42 = arith.mulf %5, %5 : vector<16x16xf32>
    %cst_41 = arith.constant dense<0.000000e+00> : vector<16x16xf32>
    %43 = tpu.matmul %42, %6, %cst_41 {dimension_numbers = #tpu.dot_dimension_numbers<[1], [0], [0], [1], [0, 0, 1, 1], [], []>} : vector<16x16xf32>, vector<16x16xf32>, vector<16x16xf32> -> vector<16x16xf32>
    %cst_42 = arith.constant dense<0.000000e+00> : vector<16x16xf32>
    %44 = tpu.matmul %7, %43, %cst_42 {dimension_numbers = #tpu.dot_dimension_numbers<[1], [0], [0], [1], [0, 0, 1, 1], [], []>} : vector<16x16xf32>, vector<16x16xf32>, vector<16x16xf32> -> vector<16x16xf32>
    %cst_43 = arith.constant dense<0.000000e+00> : vector<16x16xf32>
    %45 = tpu.matmul %1, %6, %cst_43 {dimension_numbers = #tpu.dot_dimension_numbers<[1], [0], [0], [1], [0, 0, 1, 1], [], []>} : vector<16x16xf32>, vector<16x16xf32>, vector<16x16xf32> -> vector<16x16xf32>
    %cst_44 = arith.constant dense<0.000000e+00> : vector<16x16xf32>
    %46 = tpu.matmul %7, %45, %cst_44 {dimension_numbers = #tpu.dot_dimension_numbers<[1], [0], [0], [1], [0, 0, 1, 1], [], []>} : vector<16x16xf32>, vector<16x16xf32>, vector<16x16xf32> -> vector<16x16xf32>
    %47 = arith.mulf %1, %1 : vector<16x16xf32>
    %cst_45 = arith.constant dense<0.000000e+00> : vector<16x16xf32>
    %48 = tpu.matmul %47, %6, %cst_45 {dimension_numbers = #tpu.dot_dimension_numbers<[1], [0], [0], [1], [0, 0, 1, 1], [], []>} : vector<16x16xf32>, vector<16x16xf32>, vector<16x16xf32> -> vector<16x16xf32>
    %cst_46 = arith.constant dense<0.000000e+00> : vector<16x16xf32>
    %49 = tpu.matmul %7, %48, %cst_46 {dimension_numbers = #tpu.dot_dimension_numbers<[1], [0], [0], [1], [0, 0, 1, 1], [], []>} : vector<16x16xf32>, vector<16x16xf32>, vector<16x16xf32> -> vector<16x16xf32>
    %50 = arith.mulf %1, %5 : vector<16x16xf32>
    %cst_47 = arith.constant dense<0.000000e+00> : vector<16x16xf32>
    %51 = tpu.matmul %50, %6, %cst_47 {dimension_numbers = #tpu.dot_dimension_numbers<[1], [0], [0], [1], [0, 0, 1, 1], [], []>} : vector<16x16xf32>, vector<16x16xf32>, vector<16x16xf32> -> vector<16x16xf32>
    %cst_48 = arith.constant dense<0.000000e+00> : vector<16x16xf32>
    %52 = tpu.matmul %7, %51, %cst_48 {dimension_numbers = #tpu.dot_dimension_numbers<[1], [0], [0], [1], [0, 0, 1, 1], [], []>} : vector<16x16xf32>, vector<16x16xf32>, vector<16x16xf32> -> vector<16x16xf32>
    %53 = arith.mulf %46, %46 : vector<16x16xf32>
    %54 = arith.mulf %41, %41 : vector<16x16xf32>
    %55 = arith.mulf %46, %41 : vector<16x16xf32>
    %56 = arith.subf %49, %53 : vector<16x16xf32>
    %57 = arith.subf %44, %54 : vector<16x16xf32>
    %58 = arith.subf %52, %55 : vector<16x16xf32>
    %cst_49 = arith.constant 2.000000e+00 : f32
    %59 = vector.broadcast %cst_49 : f32 to vector<16x16xf32>
    %60 = arith.mulf %59, %55 : vector<16x16xf32>
    %cst_50 = arith.constant 9.99999974E-5 : f32
    %61 = vector.broadcast %cst_50 : f32 to vector<16x16xf32>
    %62 = arith.addf %60, %61 : vector<16x16xf32>
    %cst_51 = arith.constant 2.000000e+00 : f32
    %63 = vector.broadcast %cst_51 : f32 to vector<16x16xf32>
    %64 = arith.mulf %63, %58 : vector<16x16xf32>
    %cst_52 = arith.constant 8.99999984E-4 : f32
    %65 = vector.broadcast %cst_52 : f32 to vector<16x16xf32>
    %66 = arith.addf %64, %65 : vector<16x16xf32>
    %67 = arith.mulf %62, %66 : vector<16x16xf32>
    %68 = arith.addf %53, %54 : vector<16x16xf32>
    %cst_53 = arith.constant 9.99999974E-5 : f32
    %69 = vector.broadcast %cst_53 : f32 to vector<16x16xf32>
    %70 = arith.addf %68, %69 : vector<16x16xf32>
    %71 = arith.addf %56, %57 : vector<16x16xf32>
    %cst_54 = arith.constant 8.99999984E-4 : f32
    %72 = vector.broadcast %cst_54 : f32 to vector<16x16xf32>
    %73 = arith.addf %71, %72 : vector<16x16xf32>
    %74 = arith.mulf %70, %73 : vector<16x16xf32>
    %75 = tpu.reciprocal %74 : vector<16x16xf32> -> vector<16x16xf32>
    %76 = arith.mulf %67, %75 : vector<16x16xf32>
    %77 = vector.shape_cast %76 : vector<16x16xf32> to vector<1x16x16xf32>
    %cst_55 = arith.constant dense<0.000000e+00> : vector<1xf32>
    %78 = vector.multi_reduction <add>, %77, %cst_55 [1, 2] : vector<1x16x16xf32> to vector<1xf32>
    %79 = vector.shape_cast %78 : vector<1xf32> to vector<1x1x1xf32>
    %80 = vector.extract %79[0, 0, 0] : f32 from vector<1x1x1xf32>
    %cst_56 = arith.constant 2.560000e+02 : f32
    %81 = arith.divf %80, %cst_56 : f32
    %cst_57 = arith.constant dense<0.000000e+00> : vector<16x16xf32>
    %82 = tpu.matmul %3, %6, %cst_57 {dimension_numbers = #tpu.dot_dimension_numbers<[1], [0], [0], [1], [0, 0, 1, 1], [], []>} : vector<16x16xf32>, vector<16x16xf32>, vector<16x16xf32> -> vector<16x16xf32>
    %cst_58 = arith.constant dense<0.000000e+00> : vector<16x16xf32>
    %83 = tpu.matmul %7, %82, %cst_58 {dimension_numbers = #tpu.dot_dimension_numbers<[1], [0], [0], [1], [0, 0, 1, 1], [], []>} : vector<16x16xf32>, vector<16x16xf32>, vector<16x16xf32> -> vector<16x16xf32>
    %84 = arith.mulf %3, %3 : vector<16x16xf32>
    %cst_59 = arith.constant dense<0.000000e+00> : vector<16x16xf32>
    %85 = tpu.matmul %84, %6, %cst_59 {dimension_numbers = #tpu.dot_dimension_numbers<[1], [0], [0], [1], [0, 0, 1, 1], [], []>} : vector<16x16xf32>, vector<16x16xf32>, vector<16x16xf32> -> vector<16x16xf32>
    %cst_60 = arith.constant dense<0.000000e+00> : vector<16x16xf32>
    %86 = tpu.matmul %7, %85, %cst_60 {dimension_numbers = #tpu.dot_dimension_numbers<[1], [0], [0], [1], [0, 0, 1, 1], [], []>} : vector<16x16xf32>, vector<16x16xf32>, vector<16x16xf32> -> vector<16x16xf32>
    %87 = arith.mulf %3, %5 : vector<16x16xf32>
    %cst_61 = arith.constant dense<0.000000e+00> : vector<16x16xf32>
    %88 = tpu.matmul %87, %6, %cst_61 {dimension_numbers = #tpu.dot_dimension_numbers<[1], [0], [0], [1], [0, 0, 1, 1], [], []>} : vector<16x16xf32>, vector<16x16xf32>, vector<16x16xf32> -> vector<16x16xf32>
    %cst_62 = arith.constant dense<0.000000e+00> : vector<16x16xf32>
    %89 = tpu.matmul %7, %88, %cst_62 {dimension_numbers = #tpu.dot_dimension_numbers<[1], [0], [0], [1], [0, 0, 1, 1], [], []>} : vector<16x16xf32>, vector<16x16xf32>, vector<16x16xf32> -> vector<16x16xf32>
    %90 = arith.mulf %83, %83 : vector<16x16xf32>
    %91 = arith.mulf %41, %41 : vector<16x16xf32>
    %92 = arith.mulf %83, %41 : vector<16x16xf32>
    %93 = arith.subf %86, %90 : vector<16x16xf32>
    %94 = arith.subf %44, %91 : vector<16x16xf32>
    %95 = arith.subf %89, %92 : vector<16x16xf32>
    %cst_63 = arith.constant 2.000000e+00 : f32
    %96 = vector.broadcast %cst_63 : f32 to vector<16x16xf32>
    %97 = arith.mulf %96, %92 : vector<16x16xf32>
    %cst_64 = arith.constant 9.99999974E-5 : f32
    %98 = vector.broadcast %cst_64 : f32 to vector<16x16xf32>
    %99 = arith.addf %97, %98 : vector<16x16xf32>
    %cst_65 = arith.constant 2.000000e+00 : f32
    %100 = vector.broadcast %cst_65 : f32 to vector<16x16xf32>
    %101 = arith.mulf %100, %95 : vector<16x16xf32>
    %cst_66 = arith.constant 8.99999984E-4 : f32
    %102 = vector.broadcast %cst_66 : f32 to vector<16x16xf32>
    %103 = arith.addf %101, %102 : vector<16x16xf32>
    %104 = arith.mulf %99, %103 : vector<16x16xf32>
    %105 = arith.addf %90, %91 : vector<16x16xf32>
    %cst_67 = arith.constant 9.99999974E-5 : f32
    %106 = vector.broadcast %cst_67 : f32 to vector<16x16xf32>
    %107 = arith.addf %105, %106 : vector<16x16xf32>
    %108 = arith.addf %93, %94 : vector<16x16xf32>
    %cst_68 = arith.constant 8.99999984E-4 : f32
    %109 = vector.broadcast %cst_68 : f32 to vector<16x16xf32>
    %110 = arith.addf %108, %109 : vector<16x16xf32>
    %111 = arith.mulf %107, %110 : vector<16x16xf32>
    %112 = tpu.reciprocal %111 : vector<16x16xf32> -> vector<16x16xf32>
    %113 = arith.mulf %104, %112 : vector<16x16xf32>
    %114 = vector.shape_cast %113 : vector<16x16xf32> to vector<1x16x16xf32>
    %cst_69 = arith.constant dense<0.000000e+00> : vector<1xf32>
    %115 = vector.multi_reduction <add>, %114, %cst_69 [1, 2] : vector<1x16x16xf32> to vector<1xf32>
    %116 = vector.shape_cast %115 : vector<1xf32> to vector<1x1x1xf32>
    %117 = vector.extract %116[0, 0, 0] : f32 from vector<1x1x1xf32>
    %cst_70 = arith.constant 2.560000e+02 : f32
    %118 = arith.divf %117, %cst_70 : f32
    %119 = tpu.iota {dimensions = array<i32: 1>} : vector<1x128xi32>
    %c0_i32 = arith.constant 0 : i32
    %120 = vector.broadcast %c0_i32 : i32 to vector<1x128xi32>
    %121 = arith.cmpi eq, %119, %120 : vector<1x128xi32>
    %cst_71 = arith.constant 0.000000e+00 : f32
    %122 = vector.broadcast %23 : f32 to vector<1x128xf32>
    %123 = vector.broadcast %cst_71 : f32 to vector<1x128xf32>
    %124 = arith.select %121, %122, %123 : vector<1x128xi1>, vector<1x128xf32>
    %c1_i32 = arith.constant 1 : i32
    %125 = vector.broadcast %c1_i32 : i32 to vector<1x128xi32>
    %126 = arith.cmpi eq, %119, %125 : vector<1x128xi32>
    %cst_72 = arith.constant 0.000000e+00 : f32
    %127 = vector.broadcast %39 : f32 to vector<1x128xf32>
    %128 = vector.broadcast %cst_72 : f32 to vector<1x128xf32>
    %129 = arith.select %126, %127, %128 : vector<1x128xi1>, vector<1x128xf32>
    %130 = arith.addf %124, %129 : vector<1x128xf32>
    %c2_i32 = arith.constant 2 : i32
    %131 = vector.broadcast %c2_i32 : i32 to vector<1x128xi32>
    %132 = arith.cmpi eq, %119, %131 : vector<1x128xi32>
    %cst_73 = arith.constant 0.000000e+00 : f32
    %133 = vector.broadcast %81 : f32 to vector<1x128xf32>
    %134 = vector.broadcast %cst_73 : f32 to vector<1x128xf32>
    %135 = arith.select %132, %133, %134 : vector<1x128xi1>, vector<1x128xf32>
    %136 = arith.addf %130, %135 : vector<1x128xf32>
    %c3_i32 = arith.constant 3 : i32
    %137 = vector.broadcast %c3_i32 : i32 to vector<1x128xi32>
    %138 = arith.cmpi eq, %119, %137 : vector<1x128xi32>
    %cst_74 = arith.constant 0.000000e+00 : f32
    %139 = vector.broadcast %118 : f32 to vector<1x128xf32>
    %140 = vector.broadcast %cst_74 : f32 to vector<1x128xf32>
    %141 = arith.select %138, %139, %140 : vector<1x128xi1>, vector<1x128xf32>
    %142 = arith.addf %136, %141 : vector<1x128xf32>
    %c0_75 = arith.constant 0 : index
    %c0_76 = arith.constant 0 : index
    %c0_77 = arith.constant 0 : index
    %143 = vector.load %arg10[%c0_75, %c0_76, %c0_77] : memref<1x1x128xf32, #tpu.memory_space<vmem>>, vector<1x1x128xf32>
    %144 = vector.shape_cast %143 : vector<1x1x128xf32> to vector<1x128xf32>
    %145 = vector.shape_cast %142 : vector<1x128xf32> to vector<1x1x128xf32>
    tpu.vector_store %arg10[%c0_75, %c0_76, %c0_77], %145 {strides = array<i32>} : memref<1x1x128xf32, #tpu.memory_space<vmem>>, vector<1x1x128xf32>,
    return
  }
  func.func @transform_0(%arg0: i32) -> (i32, i32, i32) {
    %c0_i32 = arith.constant 0 : i32
    %c0_i32_0 = arith.constant 0 : i32
    %c0_i32_1 = arith.constant 0 : i32
    return %arg0, %c0_i32, %c0_i32_0 : i32, i32, i32
  }
  func.func @transform_1(%arg0: i32) -> (i32, i32, i32) {
    %c0_i32 = arith.constant 0 : i32
    %c0_i32_0 = arith.constant 0 : i32
    %c0_i32_1 = arith.constant 0 : i32
    return %arg0, %c0_i32, %c0_i32_0 : i32, i32, i32
  }
  func.func @transform_2(%arg0: i32) -> (i32, i32, i32) {
    %c0_i32 = arith.constant 0 : i32
    %c0_i32_0 = arith.constant 0 : i32
    %c0_i32_1 = arith.constant 0 : i32
    return %arg0, %c0_i32, %c0_i32_0 : i32, i32, i32
  }
  func.func @transform_3(%arg0: i32) -> (i32, i32) {
    %c0_i32 = arith.constant 0 : i32
    %c0_i32_0 = arith.constant 0 : i32
    %c0_i32_1 = arith.constant 0 : i32
    return %c0_i32, %c0_i32_0 : i32, i32
  }
  func.func @transform_4(%arg0: i32) -> (i32, i32) {
    %c0_i32 = arith.constant 0 : i32
    %c0_i32_0 = arith.constant 0 : i32
    %c0_i32_1 = arith.constant 0 : i32
    return %c0_i32, %c0_i32_0 : i32, i32
  }
  func.func @transform_5(%arg0: i32) -> (i32, i32) {
    %c0_i32 = arith.constant 0 : i32
    %c0_i32_0 = arith.constant 0 : i32
    %c0_i32_1 = arith.constant 0 : i32
    return %c0_i32, %c0_i32_0 : i32, i32
  }
  func.func @transform_6(%arg0: i32) -> (i32, i32) {
    %c0_i32 = arith.constant 0 : i32
    %c0_i32_0 = arith.constant 0 : i32
    %c0_i32_1 = arith.constant 0 : i32
    return %c0_i32, %c0_i32_0 : i32, i32
  }
  func.func @transform_7(%arg0: i32) -> (i32, i32) {
    %c0_i32 = arith.constant 0 : i32
    %c0_i32_0 = arith.constant 0 : i32
    %c0_i32_1 = arith.constant 0 : i32
    return %c0_i32, %c0_i32_0 : i32, i32
  }
  func.func @transform_8(%arg0: i32) -> (i32, i32) {
    %c0_i32 = arith.constant 0 : i32
    %c0_i32_0 = arith.constant 0 : i32
    %c0_i32_1 = arith.constant 0 : i32
    return %c0_i32, %c0_i32_0 : i32, i32
  }
  func.func @transform_9(%arg0: i32) -> (i32, i32, i32) {
    %c0_i32 = arith.constant 0 : i32
    %c0_i32_0 = arith.constant 0 : i32
    %c0_i32_1 = arith.constant 0 : i32
    return %arg0, %c0_i32, %c0_i32_0 : i32, i32, i32
  }
}

</mosaic_0001>

<bundles_post_ra>
// kernel: tpu_custom_call.1
= control target key start
LH: loop header
LB: loop body
LE: loop exit
PB: predicated region body
PF: predicated region fallthrough
CT: control target
= control target key end

     0   :  { %s4142_s0 = inlined_call_operand.hbm [shape: f32[2,16,16], index: 0, kind: input, shape index: {}]   ;;  %s4143_s1 = inlined_call_operand.hbm [shape: f32[2,16,16], index: 1, kind: input, shape index: {}]   ;;  %s4144_s2 = inlined_call_operand.hbm [shape: f32[2,16,16], index: 2, kind: input, shape index: {}]   ;;  %s4145_s3 = inlined_call_operand.hbm [shape: f32[16,16], index: 3, kind: input, shape index: {}]   ;;  %s4146_s4 = inlined_call_operand.hbm [shape: f32[16,16], index: 4, kind: input, shape index: {}]   ;;  %s4147_s5 = inlined_call_operand.vmem [shape: f32[16,16], index: 5, kind: input, shape index: {}]   ;;  %s4148_s6 = inlined_call_operand.hbm [shape: f32[16,16], index: 6, kind: input, shape index: {}]   ;;  %s4149_s7 = inlined_call_operand.hbm [shape: f32[16,16], index: 7, kind: input, shape index: {}]   ;;  %s4150_s8 = inlined_call_operand.hbm [shape: f32[16,16], index: 8, kind: input, shape index: {}]   ;;  %s4151_s9 = inlined_call_operand.hbm [shape: f32[2,1,128], index: 9, kind: output, shape index: {}]  }
   0x1   :  { %4180 = sst [smem:[#allocation30_spill]] %s4143_s1 }
   0x2   :  { %4181 = sst [smem:[#allocation31_spill]] %s4145_s3 }
   0x3   :  { %4182 = sst [smem:[#allocation32_spill]] %s4147_s5 }
   0x4   :  { %4183 = sst [smem:[#allocation33_spill]] %s4148_s6 }
   0x5   :  { %4184 = sst [smem:[#allocation34_spill]] %s4151_s9 }
   0x6   :  { %14 = vsyncpa [#allocation3], 0 }
   0x7   :  { %16 = vsyncpa [#allocation3 + $0x1], 0 }
   0x8   :  { %17 = vsyncpa [#allocation6], 0 }
   0x9   :  { %19 = vsyncpa [#allocation6 + $0x1], 0 }
   0xa   :  { %20 = vsyncpa [#allocation9], 0 }
   0xb   :  { %21 = vsyncpa [#allocation12], 0 }
   0xc   :  { %22 = vsyncpa [#allocation15], 0 }
   0xd   :  { %23 = vsyncpa [#allocation4], 0 }
   0xe   :  { %25 = vsyncpa [#allocation4 + $0x1], 0  ;;  %s3663_s30 = smov 0   ;;  %s3665_s10 = smov 0  }
   0xf   :  { %s3667_s11 = smov 0   ;;  %s3669_s12 = smov 0  }
  0x10 LB: > { %4185 = sst [smem:[#allocation23_spill]] %s3588_s30  ;;  %s3602_s13 = smov [#allocation8]   ;;  %s3600_s12 = sphi %s3669_s12, %s4230_s12   ;;  %s3596_s11 = sphi %s3667_s11, %s4234_s11   ;;  %s3592_s10 = sphi %s3665_s10, %s4233_s10   ;;  %s3588_s30 = sphi %s3663_s30, %s4232_s30  }
  0x11   : > { %4186 = sst [smem:[#allocation24_spill]] %s3600_s12  ;;  %s278_s14 = sshll.u32 %s3602_s13, 4  ;;  %s3690_s14 = int_to_ptr.vmem [resolvable:$true] %s278_s14 }
  0x12   : > { %s3684_s15 = sadd.s32 4294967295, %s3600_s12   ;;  %p2724_p0 = scmp.ge.s32.totalorder %s3600_s12, 1 }
  0x13   : > { %4187 = sst [smem:[#allocation25_spill]] %s3684_s15  ;;  %p4152_p1 = scmp.eq.s32.totalorder %s3684_s15, 0 }
  0x14   : > { %p253_p2 = scmp.eq.s32.totalorder %s3684_s15, 1  ;;  %p266_p3 = scmp.lt.s32.totalorder %s3600_s12, 3 }
  0x15   : > { %s3603_s17 = smov [#allocation11]   ;;  %s4190_s3 = sld [smem:[#allocation31_spill]] }
  0x16   : > { %p3692_p4 = pnand %p2724_p0, %p266_p3  ;;  %s307_s18 = sshll.u32 %s3603_s17, 4  ;;  %s3699_s18 = int_to_ptr.vmem [resolvable:$true] %s307_s18 }
  0x18   : > { %s4188_s16 = scalar_select %p3692_p4, 1, 0 }
  0x19   : > { %p3199_p6 = pneg %p3692_p4 }
  0x1b   : > { %p3703_p7 = pnand %p3199_p6, %p4152_p1  ;;  %s3288_s22 = scalar_lea.hbm %s4190_s3, 256 }
  0x1c   : > { %p3289_p8 = scmp.ne.s32.totalorder %s4190_s3, %s3288_s22  ;;  %p3295_p12 = scmp.lt.u32.totalorder %s3288_s22, %s4190_s3 }
  0x1d   : > { %s4189_s19 = scalar_select %p3703_p7, 1, 0 }
  0x1e   : > { %p3715_p9 = pneg %p3703_p7 }
  0x20   : > { %s4191_s25 = scalar_select %p3715_p9, 1, 0 }
  0x21   : > { %p3291_p10 = pnand %p3715_p9, %p3289_p8 }
  0x23   : > { %p3292_p11 = pneg %p3291_p10 }
  0x25   : > { %p3297_p13 = pnand %p3295_p12, %p3292_p11 }
  0x27   : > { %3300 = shalt.err (!%p3297_p13)
}
  0x28   : > { %s3301_s28 = scalar_lea.vmem %s3690_s14, 256  ;;  %p3309_p5 = scmp.lt.s32.totalorder %s3690_s14, %s3690_s14 }
  0x29   : > { %p3302_p0 = scmp.ne.s32.totalorder %s3690_s14, %s3301_s28  ;;  %p3310_p1 = scmp.lt.s32.totalorder %s3301_s28, %s3301_s28 }
  0x2b   : > { %p3304_p3 = pnand %p3302_p0, %p3715_p9  ;;  %p3311_p8 = por %p3310_p1, %p3309_p5 }
  0x2d   : > { %p3305_p6 = pneg %p3304_p3 }
  0x2f   : > { %p3312_p10 = pnand %p3311_p8, %p3305_p6 }
  0x31   : > { %3315 = shalt.err (!%p3312_p10)
}
  0x32   : > { %s4154_s29 = smov 128   ;;  %s4156_s13 = smov 8  }
  0x33   : > { %3202 = dma.hbm_to_vmem [thread:$0]  (!%p3703_p7), %s4190_s3, 256, %s3690_s14, [#allocation9], %s4154_s29, %s4154_s29, %s4156_s13  }
  0x34   : > { %s4192_s6 = sld [smem:[#allocation33_spill]] }
  0x3a   : > { %s3316_s23 = scalar_lea.hbm %s4192_s6, 256 }
  0x3b   : > { %p3317_p1 = scmp.ne.s32.totalorder %s4192_s6, %s3316_s23  ;;  %p3323_p12 = scmp.lt.u32.totalorder %s3316_s23, %s4192_s6 }
  0x3d   : > { %p3319_p5 = pnand %p3317_p1, %p3715_p9 }
  0x3f   : > { %p3320_p11 = pneg %p3319_p5 }
  0x41   : > { %p3325_p13 = pnand %p3323_p12, %p3320_p11 }
  0x43   : > { %3328 = shalt.err (!%p3325_p13)
}
  0x44   : > { %s3329_s14 = scalar_lea.vmem %s3699_s18, 256  ;;  %p3337_p8 = scmp.lt.s32.totalorder %s3699_s18, %s3699_s18 }
  0x45   : > { %p3330_p0 = scmp.ne.s32.totalorder %s3699_s18, %s3329_s14  ;;  %p3338_p10 = scmp.lt.s32.totalorder %s3329_s14, %s3329_s14 }
  0x47   : > { %p3332_p3 = pnand %p3330_p0, %p3715_p9  ;;  %p3339_p1 = por %p3338_p10, %p3337_p8 }
  0x49   : > { %p3333_p6 = pneg %p3332_p3 }
  0x4b   : > { %p3340_p5 = pnand %p3339_p1, %p3333_p6 }
  0x4d   : > { %3343 = shalt.err (!%p3340_p5)
}
  0x4e   : > { %3208 = dma.hbm_to_vmem [thread:$0]  (!%p3703_p7), %s4192_s6, 256, %s3699_s18, [#allocation12], %s4154_s29, %s4154_s29, %s4156_s13  }
  0x4f   : > { %s2723_s21 = sadd.s32 4294967294, %s3600_s12   ;;  %s3767_s22 = sadd.s32 1, %s3600_s12  }
  0x50   : > { %4193 = sst [smem:[#allocation26_spill]] %s3767_s22  ;;  %s38_s23 = sadd.s32 1, %s3596_s11 }
  0x51   : > { %s35_s24 = ssub.s32 %s3600_s12, %s3767_s22  ;;  %p45_p11 = scmp.ne.s32.totalorder %s3596_s11, %s3592_s10 }
  0x52   : > { %p36_p12 = scmp.eq.s32.totalorder %s35_s24, 0  ;;  %p46_p13 = scmp.eq.s32.totalorder %s3600_s12, 0 }
  0x53   : > { %p51_p0 = scmp.ne.s32.totalorder %s3592_s10, %s3588_s30  ;;  %p3779_p3 = por %p253_p2, %p45_p11 }
  0x54   : > { %s3784_s27 = scalar_select %p36_p12, %s3596_s11, %s38_s23  }
  0x55   : > { %s4194_s26 = scalar_select %p3779_p3, 1, 0 }
  0x56   : > { %4196 = sst [smem:[#allocation28_spill]] %s3784_s27  ;;  %p47_p6 = por %p46_p13, %p45_p11 }
  0x57   : > { %4195 = sst [smem:[#allocation27_spill]] %s4194_s26  ;;  %p4197_p8 = scmp.eq.s32.totalorder %s3684_s15, 0 }
  0x58   : > { %p259_p1 = scmp.eq.s32.totalorder %s2723_s21, 1  ;;  %p3234_p5 = scmp.lt.s32.totalorder %s3600_s12, 2 }
  0x59   : > { %p3788_p10 = por %p4197_p8, %p51_p0  ;;  %s4158_s28 = sand.u32 1, %s3596_s11  }
  0x5a   : > { %s3795_s14 = sshll.u32 %s3600_s12, 8  ;;  %p3797_p4 = por %p259_p1, %p51_p0 }
  0x5b   : > { %s4198_s18 = scalar_select %p3788_p10, 1, 0 }
  0x5c   : > { %s4199_s17 = scalar_select %p3797_p4, 1, 0 }
  0x5d   : > { %s3803_s20 = sshll.u32 %s4158_s28, 4  ;;  %p3805_p2 = pnand %p3234_p5, %p47_p6 }
  0x5e   : > { %4200 = sst [smem:[#allocation29_spill]] %s4199_s17  ;;  %s368_s24 = sand.u32 1, %s3600_s12  }
  0x5f   : > { %s4201_s23 = scalar_select %p3805_p2, 1, 0 }
  0x60   : > { %s4202_s1 = sld [smem:[#allocation30_spill]]  ;;  %s372_s3 = scalar_lea.vmem [#allocation5], %s3803_s20 }
  0x61   : > { %s379_s6 = sshll.u32 %s372_s3, 4  ;;  %s3606_s28 = smov [#allocation10]   ;;  %s3817_s6 = int_to_ptr.vmem [resolvable:$true] %s379_s6 }
  0x62   : > { %s3819_s27 = sshll.u32 %s3606_s28, 4  ;;  %s3821_s22 = scalar_lea.sflag [#allocation6], %s368_s24  ;;  %s292_s27 = int_to_ptr.vmem [resolvable:$true] %s3819_s27 }
  0x63   : > { %p3827_p12 = pneg %p3805_p2 }
  0x65   : > { %s4203_s29 = scalar_select %p3827_p12, 1, 0 }
  0x66   : > { %s3814_s13 = scalar_lea.hbm %s4202_s1, %s3795_s14  ;;  %s3349_s12 = scalar_lea.hbm %s4202_s1, 512 }
  0x67   : > { %s3344_s17 = scalar_lea.hbm %s3814_s13, 256  ;;  %p3350_p6 = scmp.lt.u32.totalorder %s3814_s13, %s4202_s1 }
  0x68   : > { %p3345_p11 = scmp.ne.s32.totalorder %s3814_s13, %s3344_s17  ;;  %p3351_p8 = scmp.lt.u32.totalorder %s3349_s12, %s3344_s17 }
  0x69   : > { %p3353_p5 = scmp.lt.u32.totalorder %s3344_s17, %s3814_s13 }
  0x6a   : > { %p3347_p13 = pnand %p3827_p12, %p3345_p11  ;;  %p3352_p1 = por %p3351_p8, %p3350_p6 }
  0x6c   : > { %p3348_p0 = pneg %p3347_p13  ;;  %p3354_p4 = por %p3353_p5, %p3352_p1 }
  0x6e   : > { %p3355_p3 = pnand %p3354_p4, %p3348_p0 }
  0x70   : > { %3358 = shalt.err (!%p3355_p3)
}
  0x71   : > { %s3359_s24 = scalar_lea.vmem %s3817_s6, 256  ;;  %s3607_s21 = smov [#allocation5]  }
  0x72   : > { %p3360_p11 = scmp.ne.s32.totalorder %s3817_s6, %s3359_s24  ;;  %s3364_s3 = sshll.u32 %s3607_s21, 4  ;;  %s3365_s3 = int_to_ptr.vmem [resolvable:$false] %s3364_s3 }
  0x73   : > { %s3366_s30 = scalar_lea.vmem %s3365_s3, 512  ;;  %p3367_p7 = scmp.lt.s32.totalorder %s3817_s6, %s3365_s3 }
  0x74   : > { %p3362_p13 = pnand %p3360_p11, %p3827_p12  ;;  %p3368_p9 = scmp.lt.s32.totalorder %s3366_s30, %s3359_s24 }
  0x76   : > { %p3363_p10 = pneg %p3362_p13  ;;  %p3369_p6 = por %p3368_p9, %p3367_p7 }
  0x78   : > { %p3370_p8 = pnand %p3369_p6, %p3363_p10 }
  0x7a   : > { %3373 = shalt.err (!%p3370_p8)
}
  0x7b   : > { %s4204_s12 = smov 8   ;;  %s4205_s17 = smov 128  }
  0x7c   : > { %3221 = dma.hbm_to_vmem [thread:$0]  (!%p3805_p2), %s3814_s13, 256, %s3817_s6, %s3821_s22, %s4205_s17, %s4205_s17, %s4204_s12  }
  0x7d   : > { %s3374_s3 = scalar_lea.hbm %s4146_s4, 256  ;;  %p4206_p7 = scmp.ne.s32.totalorder %s4191_s25, 0 }
  0x7e   : > { %p3375_p4 = scmp.ne.s32.totalorder %s4146_s4, %s3374_s3  ;;  %p3381_p10 = scmp.lt.u32.totalorder %s3374_s3, %s4146_s4 }
  0x80   : > { %p3377_p9 = pnand %p3375_p4, %p4206_p7 }
  0x82   : > { %p3378_p3 = pneg %p3377_p9 }
  0x84   : > { %p3383_p0 = pnand %p3381_p10, %p3378_p3 }
  0x86   : > { %3386 = shalt.err (!%p3383_p0)
}
  0x87   : > { %s3387_s26 = scalar_lea.vmem %s292_s27, 256  ;;  %p3395_p13 = scmp.lt.s32.totalorder %s292_s27, %s292_s27 }
  0x88   : > { %p3388_p1 = scmp.ne.s32.totalorder %s292_s27, %s3387_s26  ;;  %p3396_p6 = scmp.lt.s32.totalorder %s3387_s26, %s3387_s26 }
  0x8a   : > { %p3390_p5 = pnand %p3388_p1, %p4206_p7  ;;  %p3397_p8 = por %p3396_p6, %p3395_p13 }
  0x8c   : > { %p3391_p11 = pneg %p3390_p5 }
  0x8e   : > { %p3398_p2 = pnand %p3397_p8, %p3391_p11 }
  0x90   : > { %3401 = shalt.err (!%p3398_p2)
}
  0x91   : > { %p4207_p4 = scmp.ne.s32.totalorder %s4189_s19, 0  ;;  %s3608_s9 = smov [#allocation13]  }
  0x92   : > { %s320_s13 = sshll.u32 %s3608_s9, 4  ;;  %s3609_s28 = smov [#allocation14]   ;;  %s321_s13 = int_to_ptr.vmem [resolvable:$true] %s320_s13 }
  0x93   : > { %3205 = dma.hbm_to_vmem [thread:$0]  (!%p4207_p4), %s4146_s4, 256, %s292_s27, [#allocation9], %s4205_s17, %s4205_s17, %s4204_s12  }
  0x94   : > { %s333_s21 = sshll.u32 %s3609_s28, 4  ;;  %s3402_s24 = scalar_lea.hbm %s4149_s7, 256  ;;  %s334_s21 = int_to_ptr.vmem [resolvable:$true] %s333_s21 }
  0x95   : > { %p3403_p2 = scmp.ne.s32.totalorder %s4149_s7, %s3402_s24  ;;  %p3409_p10 = scmp.lt.u32.totalorder %s3402_s24, %s4149_s7 }
  0x97   : > { %p3405_p9 = pnand %p3403_p2, %p4206_p7 }
  0x99   : > { %p3406_p3 = pneg %p3405_p9 }
  0x9b   : > { %p3411_p0 = pnand %p3409_p10, %p3406_p3 }
  0x9d   : > { %3414 = shalt.err (!%p3411_p0)
}
  0x9e   : > { %s3415_s27 = scalar_lea.vmem %s321_s13, 256  ;;  %p3423_p13 = scmp.lt.s32.totalorder %s321_s13, %s321_s13 }
  0x9f   : > { %p3416_p1 = scmp.ne.s32.totalorder %s321_s13, %s3415_s27  ;;  %p3424_p6 = scmp.lt.s32.totalorder %s3415_s27, %s3415_s27 }
  0xa1   : > { %p3418_p5 = pnand %p3416_p1, %p4206_p7  ;;  %p3425_p8 = por %p3424_p6, %p3423_p13 }
  0xa3   : > { %p3419_p11 = pneg %p3418_p5 }
  0xa5   : > { %p3426_p12 = pnand %p3425_p8, %p3419_p11 }
  0xa7   : > { %3429 = shalt.err (!%p3426_p12)
}
  0xa8   : > { %3211 = dma.hbm_to_vmem [thread:$0]  (!%p4207_p4), %s4149_s7, 256, %s321_s13, [#allocation12], %s4205_s17, %s4205_s17, %s4204_s12  }
  0xa9   : > { %s3430_s28 = scalar_lea.hbm %s4150_s8, 256 }
  0xaa   : > { %p3431_p2 = scmp.ne.s32.totalorder %s4150_s8, %s3430_s28  ;;  %p3437_p3 = scmp.lt.u32.totalorder %s3430_s28, %s4150_s8 }
  0xac   : > { %p3433_p12 = pnand %p3431_p2, %p4206_p7 }
  0xae   : > { %p3434_p9 = pneg %p3433_p12 }
  0xb0   : > { %p3439_p10 = pnand %p3437_p3, %p3434_p9 }
  0xb2   : > { %3442 = shalt.err (!%p3439_p10)
}
  0xb3   : > { %s3443_s1 = scalar_lea.vmem %s334_s21, 256  ;;  %p3451_p11 = scmp.lt.s32.totalorder %s334_s21, %s334_s21 }
  0xb4   : > { %p3444_p0 = scmp.ne.s32.totalorder %s334_s21, %s3443_s1  ;;  %p3452_p13 = scmp.lt.s32.totalorder %s3443_s1, %s3443_s1 }
  0xb6   : > { %p3446_p1 = pnand %p3444_p0, %p4206_p7  ;;  %p3453_p6 = por %p3452_p13, %p3451_p11 }
  0xb8   : > { %p3447_p5 = pneg %p3446_p1 }
  0xba   : > { %p3454_p8 = pnand %p3453_p6, %p3447_p5 }
  0xbc   : > { %3457 = shalt.err (!%p3454_p8)
}
  0xbd   : > { %3214 = dma.hbm_to_vmem [thread:$0]  (!%p4207_p4), %s4150_s8, 256, %s334_s21, [#allocation15], %s4205_s17, %s4205_s17, %s4204_s12  }
  0xbe   : > { %s3922_s15 = scalar_lea.hbm %s4142_s0, %s3795_s14  ;;  %s351_s19 = scalar_lea.vmem [#allocation2], %s3803_s20 }
  0xbf   : > { %s358_s6 = sshll.u32 %s351_s19, 4  ;;  %s3931_s3 = scalar_lea.hbm %s4144_s2, %s3795_s14  ;;  %s3925_s6 = int_to_ptr.vmem [resolvable:$true] %s358_s6 }
  0xc0   : > { %s4208_s26 = sand.u32 1, %s3596_s11   ;;  %s3458_s24 = scalar_lea.hbm %s3922_s15, 256 }
  0xc1   : > { %s3935_s21 = scalar_lea.sflag [#allocation3], %s4208_s26  ;;  %p3459_p7 = scmp.ne.s32.totalorder %s3922_s15, %s3458_s24 }
  0xc2   : > { %p4209_p4 = scmp.ne.s32.totalorder %s4203_s29, 0  ;;  %s3463_s13 = scalar_lea.hbm %s4142_s0, 512 }
  0xc3   : > { %p3464_p9 = scmp.lt.u32.totalorder %s3922_s15, %s4142_s0  ;;  %p3465_p3 = scmp.lt.u32.totalorder %s3463_s13, %s3458_s24 }
  0xc4   : > { %p3461_p2 = pnand %p3459_p7, %p4209_p4  ;;  %p3467_p0 = scmp.lt.u32.totalorder %s3458_s24, %s3922_s15 }
  0xc5   : > { %p3466_p10 = por %p3465_p3, %p3464_p9 }
  0xc6   : > { %p3462_p12 = pneg %p3461_p2 }
  0xc7   : > { %p3468_p1 = por %p3467_p0, %p3466_p10 }
  0xc9   : > { %p3469_p5 = pnand %p3468_p1, %p3462_p12 }
  0xcb   : > { %3472 = shalt.err (!%p3469_p5)
}
  0xcc   : > { %s3473_s14 = scalar_lea.vmem %s3925_s6, 256  ;;  %s3610_s5 = smov [#allocation2]  }
  0xcd   : > { %p3474_p11 = scmp.ne.s32.totalorder %s3925_s6, %s3473_s14  ;;  %s3478_s19 = sshll.u32 %s3610_s5, 4  ;;  %s3479_s19 = int_to_ptr.vmem [resolvable:$false] %s3478_s19 }
  0xce   : > { %s3480_s9 = scalar_lea.vmem %s3479_s19, 512  ;;  %p3481_p8 = scmp.lt.s32.totalorder %s3925_s6, %s3479_s19 }
  0xcf   : > { %p3476_p13 = pnand %p3474_p11, %p4209_p4  ;;  %p3482_p7 = scmp.lt.s32.totalorder %s3480_s9, %s3473_s14 }
  0xd1   : > { %p3477_p6 = pneg %p3476_p13  ;;  %p3483_p2 = por %p3482_p7, %p3481_p8 }
  0xd3   : > { %p3484_p9 = pnand %p3483_p2, %p3477_p6 }
  0xd5   : > { %3487 = shalt.err (!%p3484_p9)
}
  0xd6   : > { %p4210_p12 = scmp.ne.s32.totalorder %s4201_s23, 0  ;;  %s393_s28 = scalar_lea.vmem [#allocation7], %s3803_s20 }
  0xd7   : > { %s400_s26 = sshll.u32 %s393_s28, 4  ;;  %s3488_s24 = scalar_lea.hbm %s3931_s3, 256  ;;  %s3963_s26 = int_to_ptr.vmem [resolvable:$true] %s400_s26 }
  0xd8   : > { %3218 = dma.hbm_to_vmem [thread:$0]  (!%p4210_p12), %s3922_s15, 256, %s3925_s6, %s3935_s21, %s4205_s17, %s4205_s17, %s4204_s12  }
  0xd9   : > { %p3489_p3 = scmp.ne.s32.totalorder %s3931_s3, %s3488_s24  ;;  %s3493_s13 = scalar_lea.hbm %s4144_s2, 512 }
  0xda   : > { %p3494_p1 = scmp.lt.u32.totalorder %s3931_s3, %s4144_s2  ;;  %p3495_p5 = scmp.lt.u32.totalorder %s3493_s13, %s3488_s24 }
  0xdb   : > { %p3491_p10 = pnand %p3489_p3, %p4209_p4  ;;  %p3497_p13 = scmp.lt.u32.totalorder %s3488_s24, %s3931_s3 }
  0xdc   : > { %p3496_p11 = por %p3495_p5, %p3494_p1 }
  0xdd   : > { %p3492_p0 = pneg %p3491_p10 }
  0xde   : > { %p3498_p6 = por %p3497_p13, %p3496_p11 }
  0xe0   : > { %p3499_p8 = pnand %p3498_p6, %p3492_p0 }
  0xe2   : > { %3502 = shalt.err (!%p3499_p8)
}
  0xe3   : > { %s3503_s20 = scalar_lea.vmem %s3963_s26, 256  ;;  %s3611_s15 = smov [#allocation7]  }
  0xe4   : > { %p3504_p7 = scmp.ne.s32.totalorder %s3963_s26, %s3503_s20  ;;  %s3508_s6 = sshll.u32 %s3611_s15, 4  ;;  %s3509_s6 = int_to_ptr.vmem [resolvable:$false] %s3508_s6 }
  0xe5   : > { %s3510_s21 = scalar_lea.vmem %s3509_s6, 512  ;;  %p3511_p3 = scmp.lt.s32.totalorder %s3963_s26, %s3509_s6 }
  0xe6   : > { %p3506_p2 = pnand %p3504_p7, %p4209_p4  ;;  %p3512_p10 = scmp.lt.s32.totalorder %s3510_s21, %s3503_s20 }
  0xe8   : > { %p3507_p9 = pneg %p3506_p2  ;;  %p3513_p1 = por %p3512_p10, %p3511_p3 }
  0xea   : > { %p3514_p5 = pnand %p3513_p1, %p3507_p9 }
  0xec   : > { %3517 = shalt.err (!%p3514_p5)
}
  0xed   : > { %3224 = dma.hbm_to_vmem [thread:$0]  (!%p4210_p12), %s3931_s3, 256, %s3963_s26, %s3821_s22, %s4205_s17, %s4205_s17, %s4204_s12  }
  0xee   : > { %p4211_p4 = scmp.ne.s32.totalorder %s4188_s16, 0 }
  0xef   : > { %s3993_s29 = sand.u32 (!%p4211_p4), 1, %s3592_s10   ;;  %p4212_p0 = scmp.ne.s32.totalorder (!%p4211_p4), %s4198_s18, 0 }
  0xf0   : > { %412 = sbr.rel (%p4211_p4) target bundleno = 1000 (0x3e8), region = 56  ;;  %s3996_s14 = sshll.u32 (!%p4211_p4), %s3993_s29, 4 }
  0xf1   : > { %s415_s23 = scalar_lea.sflag (!%p4211_p4), [#allocation3], %s3993_s29  ;;  %s418_s5 = scalar_lea.vmem (!%p4211_p4), [#allocation2], %s3996_s14 }
  0xf7   : > { %3563 = dma.done.wait (%p4212_p0), %s415_s23, 256  }
  0xf8   : > { %3565 = vsyncadd (%p4212_p0), %s415_s23, 4294967040  ;;  %s4213_s22 = sld [smem:[#allocation25_spill]]  ;;  %s427_s17 = scalar_lea.vmem [#allocation5], %s3996_s14 }
  0xfe   : > { %s423_s16 = sand.u32 1, %s4213_s22  }
  0xff   : > { %s424_s12 = scalar_lea.sflag [#allocation6], %s423_s16 }
 0x100   : > { %3567 = dma.done.wait (%p4212_p0), %s424_s12, 512  }
 0x101   : > { %3569 = vsyncadd (%p4212_p0), %s424_s12, 4294966784  ;;  %s436_s3 = scalar_lea.vmem [#allocation7], %s3996_s14  ;;  %p4214_p12 = scmp.eq.s32.totalorder %s4213_s22, 0 }
 0x103   : > { %3571 = dma.done.wait (%p4214_p12), [#allocation9], 512   ;;  %p4215_p11 = pmov %p4214_p12 }
 0x105   : > { %3573 = vsyncadd (%p4215_p11), [#allocation9], 4294966784  ;;  %p4216_p13 = pmov %p4215_p11 }
 0x106   : > { %p4217_p6 = pmov %p4215_p11 }
 0x107   : > { %3575 = dma.done.wait (%p4216_p13), [#allocation12], 512  }
 0x108   : > { %3577 = vsyncadd (%p4217_p6), [#allocation12], 4294966784  ;;  %p4218_p8 = pmov %p4217_p6 }
 0x109   : > { %p4219_p7 = pmov %p4217_p6 }
 0x10a   : > { %3579 = dma.done.wait (%p4218_p8), [#allocation15], 256  }
 0x10b   : > { %3581 = vsyncadd (%p4219_p7), [#allocation15], 4294967040  ;;  %vm514_vm0 = vcmask 130048   ;;  %s4220_s9 = sld [smem:[#allocation32_spill]]  ;;  %v500_v2 = vld [vmem:[%s418_s5] sm:$0xff]  ;;  %v680_v5 = vld [vmem:[#allocation13 + $0x8] sm:$0xff] }
 0x10c   : > { %2903 = vmatprep.mubr.msk.f32.mxu0 %vm514_vm0, %v500_v2  ;;  %v679_v4 = vld [vmem:[#allocation13] sm:$0xff]  ;;  %v501_v7 = vld [vmem:[%s418_s5 + $0x8] sm:$0xff]  ;;  %v506_v9 = vld [vmem:[#allocation8] sm:$0xff]  ;;  %v1655_v17 = vmul.f32 %v500_v2, %v500_v2  ;;  %s4221_s15 = sld [smem:[#allocation27_spill]]  ;;  %s2797_s21 = sshll.u32 %s4213_s22, 4 }
 0x10d   : > { %v3075_v6 = vpack.c.bf16 %v680_v5, %v679_v4  ;;  %v502_v8 = vld [vmem:[%s427_s17] sm:$0xff]  ;;  %v507_v10 = vld [vmem:[#allocation8 + $0x8] sm:$0xff]  ;;  %v1656_v18 = vmul.f32 %v501_v7, %v501_v7  ;;  %v509_v47 = vld [vmem:[#allocation10 + $0x8] sm:$0xff]  ;;  %s499_s14 = scalar_lea.vmem [#allocation16], %s3993_s29  ;;  %s4222_s12 = sld [smem:[#allocation34_spill]] }
 0x10e   : > { %v503_v11 = vld [vmem:[%s427_s17 + $0x8] sm:$0xff]  ;;  %v3099_v12 = vpack.c.bf16 %v507_v10, %v506_v9  ;;  %v504_v13 = vld [vmem:[%s436_s3] sm:$0xff]  ;;  %v2172_v21 = vmul.f32 %v502_v8, %v502_v8  ;;  %s2566_s23 = sshll.u32 %s499_s14, 4  ;;  %s2554_s18 = scalar_lea.sflag [#allocation4], %s3993_s29  ;;  %s4100_s23 = int_to_ptr.vmem [resolvable:$true] %s2566_s23 }
 0x10f   : > { %v505_v14 = vld [vmem:[%s436_s3 + $0x8] sm:$0xff]  ;;  %v1347_v15 = vmul.f32 %v504_v13, %v504_v13  ;;  %v1813_v19 = vmul.f32 %v504_v13, %v500_v2  ;;  %v2173_v22 = vmul.f32 %v503_v11, %v503_v11  ;;  %v2330_v23 = vmul.f32 %v504_v13, %v502_v8  ;;  %v510_v25 = vld [vmem:[#allocation11] sm:$0xff]  ;;  %v508_v44 = vld [vmem:[#allocation10] sm:$0xff]  ;;  %s3518_s19 = scalar_lea.vmem %s4100_s23, 16  ;;  %s3612_s22 = smov [#allocation16]  }
 0x110   : > { %v1348_v16 = vmul.f32 %v505_v14, %v505_v14  ;;  %v1814_v20 = vmul.f32 %v505_v14, %v501_v7  ;;  %v2331_v24 = vmul.f32 %v505_v14, %v503_v11  ;;  %2910 = vmatprep.mubr.msk.f32.mxu1 %vm514_vm0, %v510_v25  ;;  %v511_v31 = vld [vmem:[#allocation11 + $0x8] sm:$0xff]  ;;  %v677_v33 = vld [vmem:[#allocation14] sm:$0xff]  ;;  %p3519_p2 = scmp.ne.s32.totalorder %s4100_s23, %s3518_s19  ;;  %s3522_s28 = sshll.u32 %s3612_s22, 4  ;;  %s3523_s28 = int_to_ptr.vmem [resolvable:$false] %s3522_s28 }
 0x111   : > { %v512_v0 = vld [vmem:[%s4220_s9] sm:$0xff]  ;;  %v513_v1 = vld [vmem:[%s4220_s9 + $0x8] sm:$0xff]  ;;  %s3524_s26 = scalar_lea.vmem %s3523_s28, 32  ;;  %p3525_p1 = scmp.lt.s32.totalorder %s4100_s23, %s3523_s28 }
 0x112   : > { %v3067_v3 = vpack.c.bf16 %v513_v1, %v512_v0  ;;  %v678_v36 = vld [vmem:[#allocation14 + $0x8] sm:$0xff]  ;;  %p4224_p9 = scmp.ne.s32.totalorder %s4221_s15, 0  ;;  %p3526_p5 = scmp.lt.s32.totalorder %s3524_s26, %s3518_s19 }
 0x113   : > { %s4223_s17 = smov %s4222_s12  ;;  %s4098_s3 = scalar_lea.hbm %s4222_s12, %s2797_s21 }
 0x114   : > { %3068 = vmatprep.subr.bf16.mxu0 %v3067_v3  ;;  %p3520_p3 = pnand %p3519_p2, %p4224_p9  ;;  %p3527_p4 = por %p3526_p5, %p3525_p1 }
 0x115   : > { %3070 = vmatpush3.bf16.msra.mxu0 %v3067_v3 }
 0x116   : > { %3076 = vmatprep.subr.bf16.mxu0 %v3075_v6  ;;  %p3521_p10 = pneg %p3520_p3 }
 0x118   : > { %2904 = vmatmul.mubr.msk.f32.vlgmr.msra.gmra.mrb[0].mxu0 %vm514_vm0, %v501_v7  ;;  %p3528_p0 = pnand %p3527_p4, %p3521_p10 }
 0x119   : > { %3078 = vmatpush3.bf16.msra.mxu0 %v3075_v6  ;;  %2917 = vmatprep.mubr.msk.f32.mxu0 %vm514_vm0, %v500_v2 }
 0x11a   : > { %3084 = vmatprep.subr.bf16.mxu0 %v3067_v3 }
 0x11c   : > { %2918 = vmatmul.mubr.msk.f32.vlgmr.msra.gmra.mrb[2].mxu0 %vm514_vm0, %v501_v7 }
 0x11d   : > { %3086 = vmatpush3.bf16.msra.mxu0 %v3067_v3  ;;  %2931 = vmatprep.mubr.msk.f32.mxu0 %vm514_vm0, %v502_v8 }
 0x11e   : > { %3092 = vmatprep.subr.bf16.mxu0 %v3075_v6 }
 0x120   : > { %2932 = vmatmul.mubr.msk.f32.vlgmr.msra.gmra.mrb[4].mxu0 %vm514_vm0, %v503_v11 }
 0x121   : > { %3094 = vmatpush3.bf16.msra.mxu0 %v3075_v6  ;;  %2945 = vmatprep.mubr.msk.f32.mxu0 %vm514_vm0, %v502_v8 }
 0x122   : > { %3100 = vmatprep.subr.bf16.mxu0 %v3099_v12 }
 0x124   : > { %2946 = vmatmul.mubr.msk.f32.vlgmr.msra.gmra.mrb[6].mxu0 %vm514_vm0, %v503_v11 }
 0x125   : > { %3102 = vmatpush3.bf16.msra.mxu0 %v3099_v12  ;;  %2959 = vmatprep.mubr.msk.f32.mxu0 %vm514_vm0, %v504_v13 }
 0x126   : > { %3108 = vmatprep.subr.bf16.mxu0 %v3099_v12 }
 0x128   : > { %2960 = vmatmul.mubr.msk.f32.vlgmr.msra.gmra.mrb[8].mxu0 %vm514_vm0, %v505_v14 }
 0x129   : > { %3110 = vmatpush3.bf16.msra.mxu0 %v3099_v12  ;;  %2973 = vmatprep.mubr.msk.f32.mxu0 %vm514_vm0, %v1347_v15 }
 0x12a   : > { %3116 = vmatprep.subr.bf16.mxu0 %v3099_v12 }
 0x12c   : > { %2974 = vmatmul.mubr.msk.f32.vlgmr.msra.gmra.mrb[10].mxu0 %vm514_vm0, %v1348_v16 }
 0x12d   : > { %3118 = vmatpush3.bf16.msra.mxu0 %v3099_v12  ;;  %2987 = vmatprep.mubr.msk.f32.mxu0 %vm514_vm0, %v500_v2 }
 0x12e   : > { %3124 = vmatprep.subr.bf16.mxu0 %v3099_v12 }
 0x130   : > { %2988 = vmatmul.mubr.msk.f32.vlgmr.msra.gmra.mrb[12].mxu0 %vm514_vm0, %v501_v7 }
 0x131   : > { %3126 = vmatpush3.bf16.msra.mxu0 %v3099_v12  ;;  %3001 = vmatprep.mubr.msk.f32.mxu0 %vm514_vm0, %v1655_v17 }
 0x132   : > { %3132 = vmatprep.subr.bf16.mxu0 %v3099_v12 }
 0x134   : > { %3002 = vmatmul.mubr.msk.f32.vlgmr.msra.gmra.mrb[14].mxu0 %vm514_vm0, %v1656_v18 }
 0x135   : > { %3134 = vmatpush3.bf16.msra.mxu0 %v3099_v12  ;;  %3015 = vmatprep.mubr.msk.f32.mxu0 %vm514_vm0, %v1813_v19 }
 0x136   : > { %3140 = vmatprep.subr.bf16.mxu0 %v3099_v12 }
 0x138   : > { %3016 = vmatmul.mubr.msk.f32.vlgmr.msra.gmra.mrb[16].mxu0 %vm514_vm0, %v1814_v20 }
 0x139   : > { %3142 = vmatpush3.bf16.msra.mxu0 %v3099_v12  ;;  %3029 = vmatprep.mubr.msk.f32.mxu0 %vm514_vm0, %v502_v8 }
 0x13a   : > { %3148 = vmatprep.subr.bf16.mxu0 %v3099_v12 }
 0x13c   : > { %3030 = vmatmul.mubr.msk.f32.vlgmr.msra.gmra.mrb[18].mxu0 %vm514_vm0, %v503_v11 }
 0x13d   : > { %3150 = vmatpush3.bf16.msra.mxu0 %v3099_v12  ;;  %3043 = vmatprep.mubr.msk.f32.mxu0 %vm514_vm0, %v2172_v21 }
 0x13e   : > { %3156 = vmatprep.subr.bf16.mxu0 %v3099_v12 }
 0x140   : > { %3044 = vmatmul.mubr.msk.f32.vlgmr.msra.gmra.mrb[20].mxu0 %vm514_vm0, %v2173_v22 }
 0x141   : > { %3158 = vmatpush3.bf16.msra.mxu0 %v3099_v12  ;;  %3057 = vmatprep.mubr.msk.f32.mxu0 %vm514_vm0, %v2330_v23 }
 0x144   : > { %3058 = vmatmul.mubr.msk.f32.vlgmr.msra.gmra.mrb[22].mxu0 %vm514_vm0, %v2331_v24 }
 0x1eb   : > { %v2905_v26 = vpop.f32.mrb[0].mxu0 }
 0x1ec   : > { %v587_v27 = vpop.f32.mrb[1].mxu0 }
 0x1ed   : > { %v3071_v28 = vpack.c.bf16 %v2905_v26, %v587_v27 }
 0x1ef   : > { %3072 = vmatprep.subr.bf16.mxu1 %v3071_v28  ;;  %v2919_v29 = vpop.f32.mrb[2].mxu0 }
 0x1f0   : > { %3074 = vmatpush3.bf16.msra.mxu1 %v3071_v28  ;;  %v747_v30 = vpop.f32.mrb[3].mxu0 }
 0x1f1   : > { %v3079_v32 = vpack.c.bf16 %v2919_v29, %v747_v30 }
 0x1f3   : > { %2911 = vmatmul.mubr.msk.f32.vlgmr.msra.gmra.mrb[0].mxu1 %vm514_vm0, %v511_v31  ;;  %3080 = vmatprep.subr.bf16.mxu1 %v3079_v32  ;;  %v2933_v34 = vpop.f32.mrb[4].mxu0 }
 0x1f4   : > { %3082 = vmatpush3.bf16.msra.mxu1 %v3079_v32  ;;  %v930_v35 = vpop.f32.mrb[5].mxu0  ;;  %2924 = vmatprep.mubr.msk.f32.mxu1 %vm514_vm0, %v677_v33 }
 0x1f5   : > { %v3087_v37 = vpack.c.bf16 %v2933_v34, %v930_v35 }
 0x1f7   : > { %2925 = vmatmul.mubr.msk.f32.vlgmr.msra.gmra.mrb[2].mxu1 %vm514_vm0, %v678_v36  ;;  %3088 = vmatprep.subr.bf16.mxu1 %v3087_v37  ;;  %v2947_v38 = vpop.f32.mrb[6].mxu0 }
 0x1f8   : > { %3090 = vmatpush3.bf16.msra.mxu1 %v3087_v37  ;;  %v1080_v39 = vpop.f32.mrb[7].mxu0  ;;  %2938 = vmatprep.mubr.msk.f32.mxu1 %vm514_vm0, %v510_v25 }
 0x1f9   : > { %v3095_v40 = vpack.c.bf16 %v2947_v38, %v1080_v39 }
 0x1fb   : > { %2939 = vmatmul.mubr.msk.f32.vlgmr.msra.gmra.mrb[4].mxu1 %vm514_vm0, %v511_v31  ;;  %3096 = vmatprep.subr.bf16.mxu1 %v3095_v40  ;;  %v2961_v41 = vpop.f32.mrb[8].mxu0 }
 0x1fc   : > { %3098 = vmatpush3.bf16.msra.mxu1 %v3095_v40  ;;  %v1257_v42 = vpop.f32.mrb[9].mxu0  ;;  %2952 = vmatprep.mubr.msk.f32.mxu1 %vm514_vm0, %v677_v33 }
 0x1fd   : > { %v3103_v43 = vpack.c.bf16 %v2961_v41, %v1257_v42 }
 0x1ff   : > { %2953 = vmatmul.mubr.msk.f32.vlgmr.msra.gmra.mrb[6].mxu1 %vm514_vm0, %v678_v36  ;;  %3104 = vmatprep.subr.bf16.mxu1 %v3103_v43  ;;  %v2975_v45 = vpop.f32.mrb[10].mxu0 }
 0x200   : > { %3106 = vmatpush3.bf16.msra.mxu1 %v3103_v43  ;;  %v1421_v46 = vpop.f32.mrb[11].mxu0  ;;  %2966 = vmatprep.mubr.msk.f32.mxu1 %vm514_vm0, %v508_v44 }
 0x201   : > { %v3111_v48 = vpack.c.bf16 %v2975_v45, %v1421_v46 }
 0x203   : > { %2967 = vmatmul.mubr.msk.f32.vlgmr.msra.gmra.mrb[8].mxu1 %vm514_vm0, %v509_v47  ;;  %3112 = vmatprep.subr.bf16.mxu1 %v3111_v48  ;;  %v2989_v49 = vpop.f32.mrb[12].mxu0 }
 0x204   : > { %3114 = vmatpush3.bf16.msra.mxu1 %v3111_v48  ;;  %v1571_v50 = vpop.f32.mrb[13].mxu0  ;;  %2980 = vmatprep.mubr.msk.f32.mxu1 %vm514_vm0, %v508_v44 }
 0x205   : > { %v3119_v51 = vpack.c.bf16 %v2989_v49, %v1571_v50 }
 0x207   : > { %2981 = vmatmul.mubr.msk.f32.vlgmr.msra.gmra.mrb[10].mxu1 %vm514_vm0, %v509_v47  ;;  %3120 = vmatprep.subr.bf16.mxu1 %v3119_v51  ;;  %v3003_v52 = vpop.f32.mrb[14].mxu0 }
 0x208   : > { %3122 = vmatpush3.bf16.msra.mxu1 %v3119_v51  ;;  %v1729_v53 = vpop.f32.mrb[15].mxu0  ;;  %2994 = vmatprep.mubr.msk.f32.mxu1 %vm514_vm0, %v508_v44 }
 0x209   : > { %v3127_v54 = vpack.c.bf16 %v3003_v52, %v1729_v53 }
 0x20b   : > { %2995 = vmatmul.mubr.msk.f32.vlgmr.msra.gmra.mrb[12].mxu1 %vm514_vm0, %v509_v47  ;;  %3128 = vmatprep.subr.bf16.mxu1 %v3127_v54  ;;  %v3017_v55 = vpop.f32.mrb[16].mxu0 }
 0x20c   : > { %3130 = vmatpush3.bf16.msra.mxu1 %v3127_v54  ;;  %v1887_v56 = vpop.f32.mrb[17].mxu0  ;;  %3008 = vmatprep.mubr.msk.f32.mxu1 %vm514_vm0, %v508_v44 }
 0x20d   : > { %v3135_v57 = vpack.c.bf16 %v3017_v55, %v1887_v56 }
 0x20f   : > { %3009 = vmatmul.mubr.msk.f32.vlgmr.msra.gmra.mrb[14].mxu1 %vm514_vm0, %v509_v47  ;;  %3136 = vmatprep.subr.bf16.mxu1 %v3135_v57  ;;  %v3031_v58 = vpop.f32.mrb[18].mxu0 }
 0x210   : > { %3138 = vmatpush3.bf16.msra.mxu1 %v3135_v57  ;;  %v2088_v59 = vpop.f32.mrb[19].mxu0  ;;  %3022 = vmatprep.mubr.msk.f32.mxu1 %vm514_vm0, %v508_v44 }
 0x211   : > { %v3143_v60 = vpack.c.bf16 %v3031_v58, %v2088_v59 }
 0x213   : > { %3023 = vmatmul.mubr.msk.f32.vlgmr.msra.gmra.mrb[16].mxu1 %vm514_vm0, %v509_v47  ;;  %3144 = vmatprep.subr.bf16.mxu1 %v3143_v60  ;;  %v3045_v61 = vpop.f32.mrb[20].mxu0 }
 0x214   : > { %3146 = vmatpush3.bf16.msra.mxu1 %v3143_v60  ;;  %v2246_v62 = vpop.f32.mrb[21].mxu0  ;;  %3036 = vmatprep.mubr.msk.f32.mxu1 %vm514_vm0, %v508_v44 }
 0x215   : > { %v3151_v63 = vpack.c.bf16 %v3045_v61, %v2246_v62 }
 0x217   : > { %3037 = vmatmul.mubr.msk.f32.vlgmr.msra.gmra.mrb[18].mxu1 %vm514_vm0, %v509_v47  ;;  %3152 = vmatprep.subr.bf16.mxu1 %v3151_v63  ;;  %v3059_v0 = vpop.f32.mrb[22].mxu0 }
 0x218   : > { %3154 = vmatpush3.bf16.msra.mxu1 %v3151_v63  ;;  %v2404_v1 = vpop.f32.mrb[23].mxu0  ;;  %3050 = vmatprep.mubr.msk.f32.mxu1 %vm514_vm0, %v508_v44 }
 0x219   : > { %v3159_v2 = vpack.c.bf16 %v3059_v0, %v2404_v1 }
 0x21b   : > { %3051 = vmatmul.mubr.msk.f32.vlgmr.msra.gmra.mrb[20].mxu1 %vm514_vm0, %v509_v47  ;;  %3160 = vmatprep.subr.bf16.mxu1 %v3159_v2 }
 0x21c   : > { %3162 = vmatpush3.bf16.msra.mxu1 %v3159_v2  ;;  %3064 = vmatprep.mubr.msk.f32.mxu1 %vm514_vm0, %v508_v44 }
 0x21f   : > { %3065 = vmatmul.mubr.msk.f32.vlgmr.msra.gmra.mrb[22].mxu1 %vm514_vm0, %v509_v47 }
 0x2c6   : > { %v2912_v3 = vpop.f32.mrb[0].mxu1 }
 0x2c7   : > { %v668_v4 = vpop.f32.mrb[1].mxu1  ;;  %v838_v6 = vand.u32 2147483647, %v2912_v3 }
 0x2c8   : > { %v837_v9 = vand.u32 2147483647, %v668_v4 }
 0x2ca   : > { %v2926_v5 = vpop.f32.mrb[2].mxu1 }
 0x2cb   : > { %v840_v7 = vand.u32 2147483647, %v2926_v5  ;;  %v828_v8 = vpop.f32.mrb[3].mxu1 }
 0x2cc   : > { %v839_v10 = vand.u32 2147483647, %v828_v8 }
 0x2cd   : > { %v842_v11 = vadd.f32 %v840_v7, %v838_v6 }
 0x2ce   : > { %v841_v12 = vadd.f32 %v839_v10, %v837_v9  ;;  %v2940_v13 = vpop.f32.mrb[4].mxu1 }
 0x2cf   : > { %v1005_v14 = vpop.f32.mrb[5].mxu1  ;;  %v844_v15 = vsel %vm514_vm0, %v842_v11, 0.0  ;;  %v1165_v19 = vand.u32 2147483647, %v2940_v13 }
 0x2d0   : > { %v843_v16 = vsel %vm514_vm0, %v841_v12, 0.0  ;;  %v1164_v22 = vand.u32 2147483647, %v1005_v14 }
 0x2d1   : > { %v845_v17 = vadd.f32 %v844_v15, %v843_v16 }
 0x2d2   : > { %v2954_v18 = vpop.f32.mrb[6].mxu1 }
 0x2d3   : > { %v1167_v20 = vand.u32 2147483647, %v2954_v18  ;;  %v1155_v21 = vpop.f32.mrb[7].mxu1  ;;  %846 = vadd.xlane.f32.xlu0 %v845_v17 }
 0x2d4   : > { %v1166_v23 = vand.u32 2147483647, %v1155_v21 }
 0x2d5   : > { %v1169_v24 = vadd.f32 %v1167_v20, %v1165_v19 }
 0x2d6   : > { %v1168_v25 = vadd.f32 %v1166_v23, %v1164_v22  ;;  %v2968_v26 = vpop.f32.mrb[8].mxu1 }
 0x2d7   : > { %v1338_v27 = vpop.f32.mrb[9].mxu1  ;;  %v1171_v28 = vsel %vm514_vm0, %v1169_v24, 0.0  ;;  %v1974_v30 = vmul.f32 %v2968_v26, %v2968_v26 }
 0x2d8   : > { %v1170_v29 = vsel %vm514_vm0, %v1168_v25, 0.0  ;;  %v1973_v32 = vmul.f32 %v1338_v27, %v1338_v27 }
 0x2d9   : > { %v1172_v31 = vadd.f32 %v1171_v28, %v1170_v29 }
 0x2da   : > { %v2982_v33 = vpop.f32.mrb[10].mxu1 }
 0x2db   : > { %v1980_v34 = vsub.f32 %v2982_v33, %v1974_v30  ;;  %v1496_v35 = vpop.f32.mrb[11].mxu1  ;;  %1173 = vadd.xlane.f32.xlu0 %v1172_v31 }
 0x2dc   : > { %v1979_v36 = vsub.f32 %v1496_v35, %v1973_v32 }
 0x2de   : > { %v2996_v37 = vpop.f32.mrb[12].mxu1 }
 0x2df   : > { %v1972_v38 = vmul.f32 %v2996_v37, %v2996_v37  ;;  %v1976_v39 = vmul.f32 %v2996_v37, %v2968_v26  ;;  %v1646_v40 = vpop.f32.mrb[13].mxu1 }
 0x2e0   : > { %v1971_v41 = vmul.f32 %v1646_v40, %v1646_v40  ;;  %v1975_v42 = vmul.f32 %v1646_v40, %v1338_v27 }
 0x2e1   : > { %v1994_v43 = vadd.f32 %v1974_v30, %v1972_v38  ;;  %v1984_v50 = vmul.f32 2.0, %v1976_v39 }
 0x2e2   : > { %v1993_v44 = vadd.f32 %v1973_v32, %v1971_v41  ;;  %v3010_v45 = vpop.f32.mrb[14].mxu1  ;;  %v1983_v51 = vmul.f32 2.0, %v1975_v42 }
 0x2e3   : > { %v1978_v46 = vsub.f32 %v3010_v45, %v1972_v38  ;;  %v1804_v47 = vpop.f32.mrb[15].mxu1  ;;  %v1996_v54 = vadd.f32 0.0001, %v1994_v43  ;;  %v1986_v63 = vadd.f32 0.0001, %v1984_v50 }
 0x2e4   : > { %v1977_v48 = vsub.f32 %v1804_v47, %v1971_v41  ;;  %v1995_v58 = vadd.f32 0.0001, %v1993_v44  ;;  %v1985_v0 = vadd.f32 0.0001, %v1983_v51 }
 0x2e5   : > { %v1998_v49 = vadd.f32 %v1980_v34, %v1978_v46 }
 0x2e6   : > { %v1997_v52 = vadd.f32 %v1979_v36, %v1977_v48  ;;  %v3024_v53 = vpop.f32.mrb[16].mxu1 }
 0x2e7   : > { %v2000_v55 = vadd.f32 0.0009, %v1998_v49  ;;  %v1982_v56 = vsub.f32 %v3024_v53, %v1976_v39  ;;  %v1962_v57 = vpop.f32.mrb[17].mxu1 }
 0x2e8   : > { %v1999_v59 = vadd.f32 0.0009, %v1997_v52  ;;  %v1981_v60 = vsub.f32 %v1962_v57, %v1975_v42 }
 0x2e9   : > { %v2002_v61 = vmul.f32 %v2000_v55, %v1996_v54  ;;  %v1988_v62 = vmul.f32 2.0, %v1982_v56 }
 0x2ea   : > { %v2001_v1 = vmul.f32 %v1999_v59, %v1995_v58  ;;  %v1987_v2 = vmul.f32 2.0, %v1981_v60  ;;  %v3038_v3 = vpop.f32.mrb[18].mxu1 }
 0x2eb   : > { %3280 = vrcp.f32 %v2002_v61  ;;  %v1990_v4 = vadd.f32 0.0009, %v1988_v62  ;;  %v2489_v5 = vmul.f32 %v3038_v3, %v3038_v3  ;;  %v2491_v6 = vmul.f32 %v3038_v3, %v2968_v26  ;;  %v2163_v7 = vpop.f32.mrb[19].mxu1 }
 0x2ec   : > { %3282 = vrcp.f32 %v2001_v1  ;;  %v1989_v8 = vadd.f32 0.0009, %v1987_v2  ;;  %v2488_v9 = vmul.f32 %v2163_v7, %v2163_v7  ;;  %v2490_v10 = vmul.f32 %v2163_v7, %v1338_v27 }
 0x2ed   : > { %v1992_v11 = vmul.f32 %v1990_v4, %v1986_v63  ;;  %v2507_v12 = vadd.f32 %v2489_v5, %v1974_v30  ;;  %v2497_v22 = vmul.f32 2.0, %v2491_v6 }
 0x2ee   : > { %v1991_v13 = vmul.f32 %v1989_v8, %v1985_v0  ;;  %v2506_v14 = vadd.f32 %v2488_v9, %v1973_v32  ;;  %v3052_v15 = vpop.f32.mrb[20].mxu1  ;;  %v2496_v28 = vmul.f32 2.0, %v2490_v10 }
 0x2ef   : > { %v2493_v16 = vsub.f32 %v3052_v15, %v2489_v5  ;;  %v2321_v17 = vpop.f32.mrb[21].mxu1  ;;  %v2509_v23 = vadd.f32 0.0001, %v2507_v12  ;;  %v2499_v40 = vadd.f32 0.0001, %v2497_v22 }
 0x2f0   : > { %v2492_v18 = vsub.f32 %v2321_v17, %v2488_v9  ;;  %v2508_v29 = vadd.f32 0.0001, %v2506_v14  ;;  %v2498_v41 = vadd.f32 0.0001, %v2496_v28 }
 0x2f1   : > { %v2511_v19 = vadd.f32 %v2493_v16, %v1980_v34 }
 0x2f2   : > { %v2510_v20 = vadd.f32 %v2492_v18, %v1979_v36  ;;  %v3066_v21 = vpop.f32.mrb[22].mxu1 }
 0x2f3   : > { %v2513_v24 = vadd.f32 0.0009, %v2511_v19  ;;  %v2495_v25 = vsub.f32 %v3066_v21, %v2491_v6  ;;  %v2479_v26 = vpop.f32.mrb[23].mxu1  ;;  %v2535_v19 = vlaneseq }
 0x2f4   : > { %v2512_v31 = vadd.f32 0.0009, %v2510_v20  ;;  %v2494_v27 = vsub.f32 %v2479_v26, %v2490_v10 }
 0x2f5   : > { %v3281_v33 = vpop.eup %3280  ;;  %v2515_v30 = vmul.f32 %v2513_v24, %v2509_v23  ;;  %v2501_v35 = vmul.f32 2.0, %v2495_v25  ;;  %v2536_v20 = vand.u32 127, %v2535_v19 }
 0x2f6   : > { %v3283_v32 = vpop.eup %3282  ;;  %v2514_v37 = vmul.f32 %v2512_v31, %v2508_v29  ;;  %v2500_v38 = vmul.f32 2.0, %v2494_v27  ;;  %v2006_v39 = vmul.f32 %v3281_v33, %v1992_v11 }
 0x2f7   : > { %3284 = vrcp.f32 %v2515_v30  ;;  %v2503_v34 = vadd.f32 0.0009, %v2501_v35  ;;  %v2005_v36 = vmul.f32 %v3283_v32, %v1991_v13  ;;  %vm2540_vm1 = vcmp.eq.s32.totalorder %v2536_v20, 1 }
 0x2f8   : > { %3286 = vrcp.f32 %v2514_v37  ;;  %v2502_v42 = vadd.f32 0.0009, %v2500_v38  ;;  %v2008_v43 = vsel %vm514_vm0, %v2006_v39, 0.0  ;;  %vm2537_vm2 = vcmp.eq.s32.totalorder %v2536_v20, 0 }
 0x2f9   : > { %v2505_v44 = vmul.f32 %v2503_v34, %v2499_v40  ;;  %v2007_v45 = vsel %vm514_vm0, %v2005_v36, 0.0  ;;  %vm2544_vm3 = vcmp.eq.s32.totalorder %v2536_v20, 2  ;;  %vm2548_vm4 = vcmp.eq.s32.totalorder %v2536_v20, 3 }
 0x2fa   : > { %v2504_v46 = vmul.f32 %v2502_v42, %v2498_v41  ;;  %v2009_v47 = vadd.f32 %v2008_v43, %v2007_v45 }
 0x2fc   : > { %2010 = vadd.xlane.f32.xlu1 %v2009_v47 }
 0x301   : > { %v3285_v48 = vpop.eup %3284 }
 0x302   : > { %v3287_v49 = vpop.eup %3286  ;;  %v2519_v50 = vmul.f32 %v3285_v48, %v2505_v44 }
 0x303   : > { %v2518_v51 = vmul.f32 %v3287_v49, %v2504_v46 }
 0x304   : > { %v2521_v52 = vsel %vm514_vm0, %v2519_v50, 0.0 }
 0x305   : > { %v2520_v53 = vsel %vm514_vm0, %v2518_v51, 0.0 }
 0x306   : > { %v2522_v54 = vadd.f32 %v2521_v52, %v2520_v53 }
 0x308   : > { %2523 = vadd.xlane.f32.xlu1 %v2522_v54 }
 0x360   : > { %v847_v55 = vpop.xlane.xlu0 %846 }
 0x361   : > { %v848_v56 = vrot.slane %v847_v55, 4 }
 0x363   : > { %v849_v57 = vadd.f32 %v848_v56, %v847_v55 }
 0x365   : > { %v850_v58 = vrot.slane %v849_v57, 2 }
 0x367   : > { %v851_v59 = vadd.f32 %v850_v58, %v849_v57 }
 0x368   : > { %v1174_v60 = vpop.xlane.xlu0 %1173 }
 0x369   : > { %v1175_v61 = vrot.slane %v1174_v60, 4  ;;  %v852_v62 = vrot.slane %v851_v59, 1 }
 0x36b   : > { %v1176_v63 = vadd.f32 %v1175_v61, %v1174_v60  ;;  %v853_v0 = vadd.f32 %v852_v62, %v851_v59 }
 0x36d   : > { %v1177_v1 = vrot.slane %v1176_v63, 2  ;;  %3163 = vpush %v853_v0 }
 0x36f   : > { %v1178_v2 = vadd.f32 %v1177_v1, %v1176_v63 }
 0x371   : > { %v1179_v3 = vrot.slane %v1178_v2, 1 }
 0x373   : > { %v1180_v4 = vadd.f32 %v1179_v3, %v1178_v2 }
 0x375   : > { %3165 = vpush %v1180_v4 }
 0x389   : > { %v2011_v5 = vpop.xlane.xlu1 %2010 }
 0x38a   : > { %v2012_v6 = vrot.slane %v2011_v5, 4 }
 0x38c   : > { %v2013_v7 = vadd.f32 %v2012_v6, %v2011_v5 }
 0x38e   : > { %v2014_v8 = vrot.slane %v2013_v7, 2 }
 0x390   : > { %v2015_v9 = vadd.f32 %v2014_v8, %v2013_v7 }
 0x392   : > { %v2016_v10 = vrot.slane %v2015_v9, 1 }
 0x394   : > { %v2017_v11 = vadd.f32 %v2016_v10, %v2015_v9 }
 0x395   : > { %v2524_v12 = vpop.xlane.xlu1 %2523 }
 0x396   : > { %v2525_v13 = vrot.slane %v2524_v12, 4  ;;  %3167 = vpush %v2017_v11 }
 0x398   : > { %v2526_v14 = vadd.f32 %v2525_v13, %v2524_v12 }
 0x39a   : > { %v2527_v15 = vrot.slane %v2526_v14, 2 }
 0x39c   : > { %v2528_v16 = vadd.f32 %v2527_v15, %v2526_v14 }
 0x39e   : > { %v2529_v17 = vrot.slane %v2528_v16, 1  ;;  %s3164_s24 = spop %3163 }
 0x39f   : > { %s857_s27 = smul.f32 0.00390625, %s3164_s24 }
 0x3a0   : > { %v2530_v18 = vadd.f32 %v2529_v17, %v2528_v16 }
 0x3a1   : > { %v2538_v22 = vstv %s857_s27 }
 0x3a2   : > { %3169 = vpush %v2530_v18  ;;  %v2539_v25 = vsel %vm2537_vm2, %v2538_v22, 0.0 }
 0x3a6   : > { %s3166_s30 = spop %3165 }
 0x3a7   : > { %s1184_s13 = smul.f32 0.00390625, %s3166_s30 }
 0x3a9   : > { %v2541_v21 = vstv %s1184_s13 }
 0x3aa   : > { %v2542_v24 = vsel %vm2540_vm1, %v2541_v21, 0.0 }
 0x3ab   : > { %v2543_v28 = vadd.f32 %v2542_v24, %v2539_v25 }
 0x3c7   : > { %s3168_s1 = spop %3167 }
 0x3c8   : > { %s2021_s25 = smul.f32 0.00390625, %s3168_s1 }
 0x3ca   : > { %v2545_v23 = vstv %s2021_s25 }
 0x3cb   : > { %v2546_v26 = vsel %vm2544_vm3, %v2545_v23, 0.0 }
 0x3cc   : > { %v2547_v29 = vadd.f32 %v2546_v26, %v2543_v28 }
 0x3d3   : > { %s3170_s20 = spop %3169 }
 0x3d4   : > { %s2534_s6 = smul.f32 0.00390625, %s3170_s20 }
 0x3d6   : > { %v2549_v31 = vstv %s2534_s6 }
 0x3d7   : > { %v2550_v27 = vsel %vm2548_vm4, %v2549_v31, 0.0 }
 0x3d8   : > { %v2551_v33 = vadd.f32 %v2550_v27, %v2547_v29 }
 0x3da   : > { %2552 = vst [vmem:[%s499_s14] sm:$0x1] %v2551_v33 }
 0x3db   : > { %3531 = shalt.err (!%p3528_p0)
}
 0x3dc   : > { %s3532_s29 = scalar_lea.hbm %s4098_s3, 16  ;;  %s3536_s1 = scalar_lea.hbm %s4223_s17, 32 }
 0x3dd   : > { %p3533_p12 = scmp.ne.s32.totalorder %s4098_s3, %s3532_s29  ;;  %p3537_p6 = scmp.lt.u32.totalorder %s4098_s3, %s4223_s17 }
 0x3de   : > { %p3538_p8 = scmp.lt.u32.totalorder %s3536_s1, %s3532_s29  ;;  %p3540_p2 = scmp.lt.u32.totalorder %s3532_s29, %s4098_s3 }
 0x3df   : > { %p3534_p11 = pnand %p3533_p12, %p4224_p9 }
 0x3e0   : > { %p3539_p7 = por %p3538_p8, %p3537_p6 }
 0x3e1   : > { %p3535_p13 = pneg %p3534_p11 }
 0x3e2   : > { %p3541_p3 = por %p3540_p2, %p3539_p7 }
 0x3e4   : > { %p3542_p10 = pnand %p3541_p3, %p3535_p13 }
 0x3e6   : > { %3545 = shalt.err (!%p3542_p10)
}
 0x3e7   : > { %3197 = dma.vmem_to_hbm [thread:$0]  (%p4224_p9), %s4100_s23, 16, %s4098_s3, %s2554_s18  }
 0x3e8 PF: > { %s4225_s25 = sld [smem:[#allocation23_spill]]  ;;  %s4226_s20 = sld [smem:[#allocation29_spill]] }
 0x3e9   : > { %s4227_s6 = sld [smem:[#allocation24_spill]] }
 0x3ee   : > { %s2578_s21 = sand.u32 1, %s4225_s25   ;;  %p4228_p1 = scmp.ne.s32.totalorder %s4226_s20, 0 }
 0x3ef   : > { %p4229_p5 = scmp.ge.s32.totalorder %s4227_s6, 2  ;;  %s2579_s14 = scalar_lea.sflag [#allocation4], %s2578_s21 }
 0x3f1   : > { %p3226_p4 = pnand %p4229_p5, %p4228_p1 }
 0x3f3   : > { %3583 = dma.done.wait (!%p3226_p4), %s2579_s14, 16  }
 0x3f4   : > { %3585 = vsyncadd (!%p3226_p4), %s2579_s14, 4294967280  ;;  %s4230_s12 = sld [smem:[#allocation26_spill]]  ;;  %s4231_s5 = sld [smem:[#allocation28_spill]] }
 0x3f5   : > { %s4232_s30 = smov %s3592_s10  ;;  %s4233_s10 = smov %s3596_s11 }
 0x3fa   : > { %p28_p0 = scmp.ge.s32.totalorder %s4230_s12, 4   ;;  %s4234_s11 = smov %s4231_s5 }
 0x3fc   :  { %30 = sbr.rel (!%p28_p0) target bundleno = 16 (0x10), region = 145 }
 0x403   :  { %2583 = vsyncpa [#allocation3], 1 }
 0x404   :  { %2585 = vsyncpa [#allocation3 + $0x1], 1 }
 0x405   :  { %2586 = vsyncpa [#allocation6], 1 }
 0x406   :  { %2588 = vsyncpa [#allocation6 + $0x1], 1 }
 0x407   :  { %2589 = vsyncpa [#allocation9], 1 }
 0x408   :  { %2590 = vsyncpa [#allocation12], 1 }
 0x409   :  { %2591 = vsyncpa [#allocation15], 1 }
 0x40a   :  { %2592 = vsyncpa [#allocation4], 1 }
 0x40b   :  { %2594 = vsyncpa [#allocation4 + $0x1], 1 }

</bundles_post_ra>
